<compile_context>
chip_gen: v7x
topology: tpu7x:2x2x1
jax: 0.10.0
libtpu: 0.0.40
codegen_flags: <defaults>
</compile_context>

<pallas_src>
import functools

import jax
import jax.numpy as jnp
from jax.experimental import pallas as pl
from jax.experimental.pallas import tpu as pltpu

GRID_SIZE = 5
SPLINE_ORDER = 3
GRID_RANGE = (-1.0, 1.0)


def _round_up(v, m):
    return (v + m - 1) // m * m


def _gaussian_kan_kernel(*refs, train, in_pad, out_pad, knots, h):
    if train:
        x_ref, w_ref, eps_ref, out_ref, acc_ref = refs
    else:
        x_ref, w_ref, out_ref, acc_ref = refs

    x = x_ref[...]                                            # (TB, IN_pad) f32

    def mxu(block, idx):
        # One K=IN_pad bf16 MXU matmul against the packed [mu | log_var] weights.
        w_slice = w_ref[idx * in_pad:(idx + 1) * in_pad, :]   # (IN_pad, 2*OUT_pad) bf16
        return jnp.dot(block.astype(jnp.bfloat16), w_slice,
                       preferred_element_type=jnp.float32)

    # SiLU(x) = x * sigmoid(x) = x * 0.5*(1 + tanh(x/2))  -- EUP tanh, no divide.
    silu = x * (0.5 * jnp.tanh(0.5 * x) + 0.5)
    acc_ref[...] = mxu(silu, 0)          # accumulator init; MXU starts immediately

    # Hoisted scaled copies: (x - k)*invK == x*invK - k*invK (knot consts fold).
    inv1 = 1.0 / h
    inv2 = 1.0 / (2.0 * h)
    inv3 = 1.0 / (3.0 * h)
    x1 = x * inv1
    x2 = x * inv2
    x3 = x * inv3

    # Streaming Cox-de Boor wavefront on the (static, uniform) knot vector.
    # Only the last row of each degree stays live (~low vreg pressure); each
    # finished cubic basis is fed straight into the MXU accumulator.
    n_knots = len(knots)
    ge_prev = (x >= knots[0]).astype(jnp.float32)
    prev0 = prev1 = prev2 = None
    for t in range(n_knots - 1):
        ge_cur = (x >= knots[t + 1]).astype(jnp.float32)
        cur0 = ge_prev - ge_cur          # indicator of [knots[t], knots[t+1])
        ge_prev = ge_cur
        cur1 = cur2 = None
        if t >= 1:
            i = t - 1
            cur1 = ((x1 - knots[i] * inv1) * prev0
                    + (knots[i + 2] * inv1 - x1) * cur0)
        if t >= 2:
            i = t - 2
            cur2 = ((x2 - knots[i] * inv2) * prev1
                    + (knots[i + 3] * inv2 - x2) * cur1)
        if t >= 3:
            i = t - 3                    # finished cubic basis index, 0 .. n_coeff-1
            b3 = ((x3 - knots[i] * inv3) * prev2
                  + (knots[i + 4] * inv3 - x3) * cur2)
            acc_ref[...] += mxu(b3, 1 + i)
        prev0, prev1, prev2 = cur0, cur1, cur2

    acts = acc_ref[...]                  # (TB, 2*OUT_pad) f32
    mu = acts[:, :out_pad]
    lv_raw = acts[:, out_pad:]
    # numerically-stable softplus
    log_var = jnp.maximum(lv_raw, 0.0) + jnp.log1p(jnp.exp(-jnp.abs(lv_raw)))

    if train:
        z = jnp.exp(0.5 * log_var) * eps_ref[...] + mu
    else:
        z = mu  # eval: epsilon == 0  =>  z = mu (exp / FMA elided)

    # Single lane-dense packed output slab: [ z | mu | log_var ].
    out_ref[:, 0:out_pad] = z
    out_ref[:, out_pad:2 * out_pad] = mu
    out_ref[:, 2 * out_pad:3 * out_pad] = log_var


def init_params(key, in_features, out_features):
    """Deterministic synthetic KANLinear parameters for mu and log_var branches."""
    k1, k2, k3, k4 = jax.random.split(key, 4)
    n_coeff = GRID_SIZE + SPLINE_ORDER
    h = (GRID_RANGE[1] - GRID_RANGE[0]) / GRID_SIZE
    knots = (jnp.arange(-SPLINE_ORDER, GRID_SIZE + SPLINE_ORDER + 1,
                        dtype=jnp.float32) * h + GRID_RANGE[0])        # (L,)
    grid_t = jnp.tile(knots[:, None], (1, in_features))                # (L, IN)

    def w(k, shape, scale):
        return (scale * jax.random.normal(k, shape)).astype(jnp.float32)

    base_scale = 1.0 / jnp.sqrt(in_features)
    spline_scale = 0.1 / jnp.sqrt(in_features)
    return dict(
        grid_t=grid_t,
        mu_base_w=w(k1, (in_features, out_features), base_scale),
        mu_spline_w=w(k2, (n_coeff, in_features, out_features), spline_scale),
        lv_base_w=w(k3, (in_features, out_features), base_scale),
        lv_spline_w=w(k4, (n_coeff, in_features, out_features), spline_scale),
    )


def pack_weights(params, in_pad, out_pad):
    """Pack [base | spline_0..spline_{n-1}] x [mu | log_var] into one zero-padded
    ((1+n_coeff)*IN_pad, 2*OUT_pad) bf16 matrix; the kernel accumulates one K=IN_pad
    MXU matmul per row-block."""
    n_coeff, in_f, out_f = params["mu_spline_w"].shape
    w = jnp.zeros(((1 + n_coeff) * in_pad, 2 * out_pad), jnp.float32)
    w = w.at[:in_f, :out_f].set(params["mu_base_w"])
    w = w.at[:in_f, out_pad:out_pad + out_f].set(params["lv_base_w"])
    for j in range(n_coeff):
        r = (1 + j) * in_pad
        w = w.at[r:r + in_f, :out_f].set(params["mu_spline_w"][j])
        w = w.at[r:r + in_f, out_pad:out_pad + out_f].set(params["lv_spline_w"][j])
    return w.astype(jnp.bfloat16)        # bf16 MXU operand (acc stays f32 in-kernel)


def gaussian_sample_kan(x, params, train=False, beta=1.0, key=None, block_b=256):
    B, in_f = x.shape
    out_f = params["mu_base_w"].shape[1]
    n_coeff = params["mu_spline_w"].shape[0]

    # Lane-dense padding (multiples of 128) and batch tiling.
    in_pad = _round_up(in_f, 128)
    out_pad = _round_up(out_f, 128)
    tb = min(block_b, _round_up(B, 8))
    # v7x has 2 TensorCores: give the "parallel" batch axis >= 2 grid steps when the
    # batch is large enough (harmless on single-TC v5e/v6e).
    if B >= 16 and _round_up(B, tb) // tb < 2:
        tb = _round_up((B + 1) // 2, 8)
    b_pad = _round_up(B, tb)

    x_p = jnp.zeros((b_pad, in_pad), jnp.float32).at[:B, :in_f].set(
        x.astype(jnp.float32))
    w_packed = pack_weights(params, in_pad, out_pad)

    h = (GRID_RANGE[1] - GRID_RANGE[0]) / GRID_SIZE
    n_knots = GRID_SIZE + 2 * SPLINE_ORDER + 1
    knots = tuple(GRID_RANGE[0] + (i - SPLINE_ORDER) * h for i in range(n_knots))

    kernel = functools.partial(_gaussian_kan_kernel, train=train,
                               in_pad=in_pad, out_pad=out_pad, knots=knots, h=h)

    in_specs = [pl.BlockSpec((tb, in_pad), lambda i: (i, 0)),
                pl.BlockSpec(w_packed.shape, lambda i: (0, 0))]
    inputs = [x_p, w_packed]
    if train:
        if key is None:
            raise ValueError("train=True requires a PRNG key")
        # TODO(synk): torch.randn is emulated with jax.random on the host and passed
        # in as epsilon; an in-kernel pltpu.prng_seed/prng_random_bits Box-Muller
        # would save one HBM stream but changes the RNG stream.
        eps = beta * jax.random.normal(key, (B, out_f), dtype=jnp.float32)
        eps_p = jnp.zeros((b_pad, out_pad), jnp.float32).at[:B, :out_f].set(eps)
        in_specs.append(pl.BlockSpec((tb, out_pad), lambda i: (i, 0)))
        inputs.append(eps_p)

    # VMEM budget: weight (double-buffered by default) + double-buffered x/eps/out
    # tiles + f32 accumulator; clamp under v7x's 64 MiB physical VMEM.
    w_bytes = int(w_packed.size) * 2
    io_bytes = (tb * in_pad + (tb * out_pad if train else 0) + tb * 3 * out_pad) * 4
    acc_bytes = tb * 2 * out_pad * 4
    est = 2 * (w_bytes + io_bytes) + acc_bytes
    vmem_limit = int(min(max(2 * est + (4 << 20), 32 << 20), 60 << 20))

    packed = pl.pallas_call(
        kernel,
        out_shape=jax.ShapeDtypeStruct((b_pad, 3 * out_pad), jnp.float32),
        grid=(b_pad // tb,),
        in_specs=in_specs,
        out_specs=pl.BlockSpec((tb, 3 * out_pad), lambda i: (i, 0)),
        scratch_shapes=[pltpu.VMEM((tb, 2 * out_pad), jnp.float32)],
        compiler_params=pltpu.CompilerParams(
            dimension_semantics=("parallel",),
            vmem_limit_bytes=vmem_limit),
    )(*inputs)

    z = packed[:B, 0:out_f]
    mu = packed[:B, out_pad:out_pad + out_f]
    log_var = packed[:B, 2 * out_pad:2 * out_pad + out_f]
    return z, mu, log_var


def _reference(x, params, epsilon):
    """Pure-JAX f32 reference of the same math (mirrors efficient-KAN KANLinear)."""
    g = params["grid_t"].T                        # (IN, L)
    xu = x[:, :, None]                            # (B, IN, 1)
    bases = ((xu >= g[None, :, :-1]) & (xu < g[None, :, 1:])).astype(x.dtype)
    for k in range(1, SPLINE_ORDER + 1):
        bases = ((xu - g[None, :, :-(k + 1)])
                 / (g[None, :, k:-1] - g[None, :, :-(k + 1)]) * bases[:, :, :-1]
                 + (g[None, :, k + 1:] - xu)
                 / (g[None, :, k + 1:] - g[None, :, 1:(-k)]) * bases[:, :, 1:])
    sx = x * jax.nn.sigmoid(x)

    def kan(bw, sw):
        return sx @ bw + jnp.einsum("bij,jio->bo", bases, sw)

    mu = kan(params["mu_base_w"], params["mu_spline_w"])
    lv = jax.nn.softplus(kan(params["lv_base_w"], params["lv_spline_w"]))
    z = jnp.exp(0.5 * lv) * epsilon + mu
    return z, mu, lv


if __name__ == "__main__":
    B, IN, OUT = 8, 32, 16
    key = jax.random.PRNGKey(0)
    kx, kp, ke = jax.random.split(key, 3)
    x = jax.random.normal(kx, (B, IN), dtype=jnp.float32)
    params = init_params(kp, IN, OUT)

    # bf16 MXU operands with f32 accumulation -> loosen vs the f32 reference.
    ATOL = RTOL = 2e-2

    # --- eval mode (PyTorch default forward) ---
    z, mu, log_var = gaussian_sample_kan(x, params, train=False)
    jax.block_until_ready((z, mu, log_var))

    eps0 = jnp.zeros((B, OUT), dtype=jnp.float32)
    z_r, mu_r, lv_r = _reference(x, params, eps0)
    assert jnp.allclose(z, z_r, atol=ATOL, rtol=RTOL)
    assert jnp.allclose(mu, mu_r, atol=ATOL, rtol=RTOL)
    assert jnp.allclose(log_var, lv_r, atol=ATOL, rtol=RTOL)
    assert jnp.allclose(z, mu, atol=1e-6)          # eval mode: z == mu

    # --- train mode (reparametrization with host-generated epsilon) ---
    beta = 0.5
    zt, mut, lvt = gaussian_sample_kan(x, params, train=True, beta=beta, key=ke)
    jax.block_until_ready((zt, mut, lvt))
    eps_t = beta * jax.random.normal(ke, (B, OUT), dtype=jnp.float32)
    zt_r, mut_r, lvt_r = _reference(x, params, eps_t)
    assert jnp.allclose(zt, zt_r, atol=ATOL, rtol=RTOL)
    assert jnp.allclose(mut, mut_r, atol=ATOL, rtol=RTOL)
    assert jnp.allclose(lvt, lvt_r, atol=ATOL, rtol=RTOL)

    print("KERNEL_OK")
</pallas_src>

<mosaic_0001>
module attributes {stable_mosaic.version = 11 : i64} {
  func.func @_gaussian_kan_kernel(%arg0: i32, %arg1: memref<8x128xf32, #tpu.memory_space<vmem>>, %arg2: memref<1152x256xbf16, #tpu.memory_space<vmem>>, %arg3: memref<8x384xf32, #tpu.memory_space<vmem>>, %arg4: memref<8x256xf32, #tpu.memory_space<vmem>>) attributes {dimension_semantics = [#tpu.dimension_semantics<parallel>], iteration_bounds = array<i64: 1>, scalar_prefetch = 0 : i64, scratch_operands = 1 : i64, tpu.core_type = #tpu.core_type<tc>, window_params = [{transform_indices = @transform_0, window_bounds = array<i64: 8, 128>}, {pipeline_mode = #tpu.pipeline_mode<synchronous>, transform_indices = @transform_1, window_bounds = array<i64: 1152, 256>}, {transform_indices = @transform_2, window_bounds = array<i64: 8, 384>}]} {
    %c0 = arith.constant 0 : index
    %c0_0 = arith.constant 0 : index
    %0 = vector.load %arg1[%c0, %c0_0] : memref<8x128xf32, #tpu.memory_space<vmem>>, vector<8x128xf32>
    %cst = arith.constant 5.000000e-01 : f32
    %1 = vector.broadcast %cst : f32 to vector<8x128xf32>
    %2 = arith.mulf %1, %0 : vector<8x128xf32>
    %3 = math.tanh %2 : vector<8x128xf32>
    %cst_1 = arith.constant 5.000000e-01 : f32
    %4 = vector.broadcast %cst_1 : f32 to vector<8x128xf32>
    %5 = arith.mulf %4, %3 : vector<8x128xf32>
    %cst_2 = arith.constant 5.000000e-01 : f32
    %6 = vector.broadcast %cst_2 : f32 to vector<8x128xf32>
    %7 = arith.addf %5, %6 : vector<8x128xf32>
    %8 = arith.mulf %0, %7 : vector<8x128xf32>
    %c0_3 = arith.constant 0 : index
    %c0_4 = arith.constant 0 : index
    %9 = vector.load %arg2[%c0_3, %c0_4] : memref<1152x256xbf16, #tpu.memory_space<vmem>>, vector<128x256xbf16>
    %10 = arith.truncf %8 : vector<8x128xf32> to vector<8x128xbf16>
    %cst_5 = arith.constant dense<0.000000e+00> : vector<8x256xf32>
    %11 = tpu.matmul %10, %9, %cst_5 {dimension_numbers = #tpu.dot_dimension_numbers<[1], [0], [0], [1], [0, 0, 1, 1], [], []>} : vector<8x128xbf16>, vector<128x256xbf16>, vector<8x256xf32> -> vector<8x256xf32>
    %c0_6 = arith.constant 0 : index
    %c0_7 = arith.constant 0 : index
    %12 = vector.load %arg4[%c0_6, %c0_7] : memref<8x256xf32, #tpu.memory_space<vmem>>, vector<8x256xf32>
    tpu.vector_store %arg4[%c0_6, %c0_7], %11 {strides = array<i32>} : memref<8x256xf32, #tpu.memory_space<vmem>>, vector<8x256xf32>,
    %cst_8 = arith.constant 2.500000e+00 : f32
    %13 = vector.broadcast %cst_8 : f32 to vector<8x128xf32>
    %14 = arith.mulf %0, %13 : vector<8x128xf32>
    %cst_9 = arith.constant 1.250000e+00 : f32
    %15 = vector.broadcast %cst_9 : f32 to vector<8x128xf32>
    %16 = arith.mulf %0, %15 : vector<8x128xf32>
    %cst_10 = arith.constant 0.833333313 : f32
    %17 = vector.broadcast %cst_10 : f32 to vector<8x128xf32>
    %18 = arith.mulf %0, %17 : vector<8x128xf32>
    %cst_11 = arith.constant -2.200000e+00 : f32
    %19 = vector.broadcast %cst_11 : f32 to vector<8x128xf32>
    %20 = arith.cmpf oge, %0, %19 : vector<8x128xf32>
    %21 = arith.extui %20 : vector<8x128xi1> to vector<8x128xi32>
    %22 = arith.sitofp %21 : vector<8x128xi32> to vector<8x128xf32>
    %cst_12 = arith.constant -1.800000e+00 : f32
    %23 = vector.broadcast %cst_12 : f32 to vector<8x128xf32>
    %24 = arith.cmpf oge, %0, %23 : vector<8x128xf32>
    %25 = arith.extui %24 : vector<8x128xi1> to vector<8x128xi32>
    %26 = arith.sitofp %25 : vector<8x128xi32> to vector<8x128xf32>
    %27 = arith.subf %22, %26 : vector<8x128xf32>
    %cst_13 = arith.constant -1.400000e+00 : f32
    %28 = vector.broadcast %cst_13 : f32 to vector<8x128xf32>
    %29 = arith.cmpf oge, %0, %28 : vector<8x128xf32>
    %30 = arith.extui %29 : vector<8x128xi1> to vector<8x128xi32>
    %31 = arith.sitofp %30 : vector<8x128xi32> to vector<8x128xf32>
    %32 = arith.subf %26, %31 : vector<8x128xf32>
    %cst_14 = arith.constant -5.500000e+00 : f32
    %33 = vector.broadcast %cst_14 : f32 to vector<8x128xf32>
    %34 = arith.subf %14, %33 : vector<8x128xf32>
    %35 = arith.mulf %34, %27 : vector<8x128xf32>
    %cst_15 = arith.constant -3.500000e+00 : f32
    %36 = vector.broadcast %cst_15 : f32 to vector<8x128xf32>
    %37 = arith.subf %36, %14 : vector<8x128xf32>
    %38 = arith.mulf %37, %32 : vector<8x128xf32>
    %39 = arith.addf %35, %38 : vector<8x128xf32>
    %cst_16 = arith.constant -1.000000e+00 : f32
    %40 = vector.broadcast %cst_16 : f32 to vector<8x128xf32>
    %41 = arith.cmpf oge, %0, %40 : vector<8x128xf32>
    %42 = arith.extui %41 : vector<8x128xi1> to vector<8x128xi32>
    %43 = arith.sitofp %42 : vector<8x128xi32> to vector<8x128xf32>
    %44 = arith.subf %31, %43 : vector<8x128xf32>
    %cst_17 = arith.constant -4.500000e+00 : f32
    %45 = vector.broadcast %cst_17 : f32 to vector<8x128xf32>
    %46 = arith.subf %14, %45 : vector<8x128xf32>
    %47 = arith.mulf %46, %32 : vector<8x128xf32>
    %cst_18 = arith.constant -2.500000e+00 : f32
    %48 = vector.broadcast %cst_18 : f32 to vector<8x128xf32>
    %49 = arith.subf %48, %14 : vector<8x128xf32>
    %50 = arith.mulf %49, %44 : vector<8x128xf32>
    %51 = arith.addf %47, %50 : vector<8x128xf32>
    %cst_19 = arith.constant -2.750000e+00 : f32
    %52 = vector.broadcast %cst_19 : f32 to vector<8x128xf32>
    %53 = arith.subf %16, %52 : vector<8x128xf32>
    %54 = arith.mulf %53, %39 : vector<8x128xf32>
    %cst_20 = arith.constant -1.250000e+00 : f32
    %55 = vector.broadcast %cst_20 : f32 to vector<8x128xf32>
    %56 = arith.subf %55, %16 : vector<8x128xf32>
    %57 = arith.mulf %56, %51 : vector<8x128xf32>
    %58 = arith.addf %54, %57 : vector<8x128xf32>
    %cst_21 = arith.constant -6.000000e-01 : f32
    %59 = vector.broadcast %cst_21 : f32 to vector<8x128xf32>
    %60 = arith.cmpf oge, %0, %59 : vector<8x128xf32>
    %61 = arith.extui %60 : vector<8x128xi1> to vector<8x128xi32>
    %62 = arith.sitofp %61 : vector<8x128xi32> to vector<8x128xf32>
    %63 = arith.subf %43, %62 : vector<8x128xf32>
    %cst_22 = arith.constant -3.500000e+00 : f32
    %64 = vector.broadcast %cst_22 : f32 to vector<8x128xf32>
    %65 = arith.subf %14, %64 : vector<8x128xf32>
    %66 = arith.mulf %65, %44 : vector<8x128xf32>
    %cst_23 = arith.constant -1.500000e+00 : f32
    %67 = vector.broadcast %cst_23 : f32 to vector<8x128xf32>
    %68 = arith.subf %67, %14 : vector<8x128xf32>
    %69 = arith.mulf %68, %63 : vector<8x128xf32>
    %70 = arith.addf %66, %69 : vector<8x128xf32>
    %cst_24 = arith.constant -2.250000e+00 : f32
    %71 = vector.broadcast %cst_24 : f32 to vector<8x128xf32>
    %72 = arith.subf %16, %71 : vector<8x128xf32>
    %73 = arith.mulf %72, %51 : vector<8x128xf32>
    %cst_25 = arith.constant -7.500000e-01 : f32
    %74 = vector.broadcast %cst_25 : f32 to vector<8x128xf32>
    %75 = arith.subf %74, %16 : vector<8x128xf32>
    %76 = arith.mulf %75, %70 : vector<8x128xf32>
    %77 = arith.addf %73, %76 : vector<8x128xf32>
    %cst_26 = arith.constant -1.83333337 : f32
    %78 = vector.broadcast %cst_26 : f32 to vector<8x128xf32>
    %79 = arith.subf %18, %78 : vector<8x128xf32>
    %80 = arith.mulf %79, %58 : vector<8x128xf32>
    %cst_27 = arith.constant -5.000000e-01 : f32
    %81 = vector.broadcast %cst_27 : f32 to vector<8x128xf32>
    %82 = arith.subf %81, %18 : vector<8x128xf32>
    %83 = arith.mulf %82, %77 : vector<8x128xf32>
    %84 = arith.addf %80, %83 : vector<8x128xf32>
    %c0_28 = arith.constant 0 : index
    %c0_29 = arith.constant 0 : index
    %85 = vector.load %arg4[%c0_28, %c0_29] : memref<8x256xf32, #tpu.memory_space<vmem>>, vector<8x256xf32>
    %c128 = arith.constant 128 : index
    %c0_30 = arith.constant 0 : index
    %86 = vector.load %arg2[%c128, %c0_30] : memref<1152x256xbf16, #tpu.memory_space<vmem>>, vector<128x256xbf16>
    %87 = arith.truncf %84 : vector<8x128xf32> to vector<8x128xbf16>
    %cst_31 = arith.constant dense<0.000000e+00> : vector<8x256xf32>
    %88 = tpu.matmul %87, %86, %cst_31 {dimension_numbers = #tpu.dot_dimension_numbers<[1], [0], [0], [1], [0, 0, 1, 1], [], []>} : vector<8x128xbf16>, vector<128x256xbf16>, vector<8x256xf32> -> vector<8x256xf32>
    %89 = arith.addf %85, %88 : vector<8x256xf32>
    %c0_32 = arith.constant 0 : index
    %c0_33 = arith.constant 0 : index
    %90 = vector.load %arg4[%c0_32, %c0_33] : memref<8x256xf32, #tpu.memory_space<vmem>>, vector<8x256xf32>
    tpu.vector_store %arg4[%c0_32, %c0_33], %89 {strides = array<i32>} : memref<8x256xf32, #tpu.memory_space<vmem>>, vector<8x256xf32>,
    %cst_34 = arith.constant -2.000000e-01 : f32
    %91 = vector.broadcast %cst_34 : f32 to vector<8x128xf32>
    %92 = arith.cmpf oge, %0, %91 : vector<8x128xf32>
    %93 = arith.extui %92 : vector<8x128xi1> to vector<8x128xi32>
    %94 = arith.sitofp %93 : vector<8x128xi32> to vector<8x128xf32>
    %95 = arith.subf %62, %94 : vector<8x128xf32>
    %cst_35 = arith.constant -2.500000e+00 : f32
    %96 = vector.broadcast %cst_35 : f32 to vector<8x128xf32>
    %97 = arith.subf %14, %96 : vector<8x128xf32>
    %98 = arith.mulf %97, %63 : vector<8x128xf32>
    %cst_36 = arith.constant -5.000000e-01 : f32
    %99 = vector.broadcast %cst_36 : f32 to vector<8x128xf32>
    %100 = arith.subf %99, %14 : vector<8x128xf32>
    %101 = arith.mulf %100, %95 : vector<8x128xf32>
    %102 = arith.addf %98, %101 : vector<8x128xf32>
    %cst_37 = arith.constant -1.750000e+00 : f32
    %103 = vector.broadcast %cst_37 : f32 to vector<8x128xf32>
    %104 = arith.subf %16, %103 : vector<8x128xf32>
    %105 = arith.mulf %104, %70 : vector<8x128xf32>
    %cst_38 = arith.constant -2.500000e-01 : f32
    %106 = vector.broadcast %cst_38 : f32 to vector<8x128xf32>
    %107 = arith.subf %106, %16 : vector<8x128xf32>
    %108 = arith.mulf %107, %102 : vector<8x128xf32>
    %109 = arith.addf %105, %108 : vector<8x128xf32>
    %cst_39 = arith.constant -1.500000e+00 : f32
    %110 = vector.broadcast %cst_39 : f32 to vector<8x128xf32>
    %111 = arith.subf %18, %110 : vector<8x128xf32>
    %112 = arith.mulf %111, %77 : vector<8x128xf32>
    %cst_40 = arith.constant -0.166666672 : f32
    %113 = vector.broadcast %cst_40 : f32 to vector<8x128xf32>
    %114 = arith.subf %113, %18 : vector<8x128xf32>
    %115 = arith.mulf %114, %109 : vector<8x128xf32>
    %116 = arith.addf %112, %115 : vector<8x128xf32>
    %c0_41 = arith.constant 0 : index
    %c0_42 = arith.constant 0 : index
    %117 = vector.load %arg4[%c0_41, %c0_42] : memref<8x256xf32, #tpu.memory_space<vmem>>, vector<8x256xf32>
    %c256 = arith.constant 256 : index
    %c0_43 = arith.constant 0 : index
    %118 = vector.load %arg2[%c256, %c0_43] : memref<1152x256xbf16, #tpu.memory_space<vmem>>, vector<128x256xbf16>
    %119 = arith.truncf %116 : vector<8x128xf32> to vector<8x128xbf16>
    %cst_44 = arith.constant dense<0.000000e+00> : vector<8x256xf32>
    %120 = tpu.matmul %119, %118, %cst_44 {dimension_numbers = #tpu.dot_dimension_numbers<[1], [0], [0], [1], [0, 0, 1, 1], [], []>} : vector<8x128xbf16>, vector<128x256xbf16>, vector<8x256xf32> -> vector<8x256xf32>
    %121 = arith.addf %117, %120 : vector<8x256xf32>
    %c0_45 = arith.constant 0 : index
    %c0_46 = arith.constant 0 : index
    %122 = vector.load %arg4[%c0_45, %c0_46] : memref<8x256xf32, #tpu.memory_space<vmem>>, vector<8x256xf32>
    tpu.vector_store %arg4[%c0_45, %c0_46], %121 {strides = array<i32>} : memref<8x256xf32, #tpu.memory_space<vmem>>, vector<8x256xf32>,
    %cst_47 = arith.constant 2.000000e-01 : f32
    %123 = vector.broadcast %cst_47 : f32 to vector<8x128xf32>
    %124 = arith.cmpf oge, %0, %123 : vector<8x128xf32>
    %125 = arith.extui %124 : vector<8x128xi1> to vector<8x128xi32>
    %126 = arith.sitofp %125 : vector<8x128xi32> to vector<8x128xf32>
    %127 = arith.subf %94, %126 : vector<8x128xf32>
    %cst_48 = arith.constant -1.500000e+00 : f32
    %128 = vector.broadcast %cst_48 : f32 to vector<8x128xf32>
    %129 = arith.subf %14, %128 : vector<8x128xf32>
    %130 = arith.mulf %129, %95 : vector<8x128xf32>
    %cst_49 = arith.constant 5.000000e-01 : f32
    %131 = vector.broadcast %cst_49 : f32 to vector<8x128xf32>
    %132 = arith.subf %131, %14 : vector<8x128xf32>
    %133 = arith.mulf %132, %127 : vector<8x128xf32>
    %134 = arith.addf %130, %133 : vector<8x128xf32>
    %cst_50 = arith.constant -1.250000e+00 : f32
    %135 = vector.broadcast %cst_50 : f32 to vector<8x128xf32>
    %136 = arith.subf %16, %135 : vector<8x128xf32>
    %137 = arith.mulf %136, %102 : vector<8x128xf32>
    %cst_51 = arith.constant 2.500000e-01 : f32
    %138 = vector.broadcast %cst_51 : f32 to vector<8x128xf32>
    %139 = arith.subf %138, %16 : vector<8x128xf32>
    %140 = arith.mulf %139, %134 : vector<8x128xf32>
    %141 = arith.addf %137, %140 : vector<8x128xf32>
    %cst_52 = arith.constant -1.16666663 : f32
    %142 = vector.broadcast %cst_52 : f32 to vector<8x128xf32>
    %143 = arith.subf %18, %142 : vector<8x128xf32>
    %144 = arith.mulf %143, %109 : vector<8x128xf32>
    %cst_53 = arith.constant 0.166666672 : f32
    %145 = vector.broadcast %cst_53 : f32 to vector<8x128xf32>
    %146 = arith.subf %145, %18 : vector<8x128xf32>
    %147 = arith.mulf %146, %141 : vector<8x128xf32>
    %148 = arith.addf %144, %147 : vector<8x128xf32>
    %c0_54 = arith.constant 0 : index
    %c0_55 = arith.constant 0 : index
    %149 = vector.load %arg4[%c0_54, %c0_55] : memref<8x256xf32, #tpu.memory_space<vmem>>, vector<8x256xf32>
    %c384 = arith.constant 384 : index
    %c0_56 = arith.constant 0 : index
    %150 = vector.load %arg2[%c384, %c0_56] : memref<1152x256xbf16, #tpu.memory_space<vmem>>, vector<128x256xbf16>
    %151 = arith.truncf %148 : vector<8x128xf32> to vector<8x128xbf16>
    %cst_57 = arith.constant dense<0.000000e+00> : vector<8x256xf32>
    %152 = tpu.matmul %151, %150, %cst_57 {dimension_numbers = #tpu.dot_dimension_numbers<[1], [0], [0], [1], [0, 0, 1, 1], [], []>} : vector<8x128xbf16>, vector<128x256xbf16>, vector<8x256xf32> -> vector<8x256xf32>
    %153 = arith.addf %149, %152 : vector<8x256xf32>
    %c0_58 = arith.constant 0 : index
    %c0_59 = arith.constant 0 : index
    %154 = vector.load %arg4[%c0_58, %c0_59] : memref<8x256xf32, #tpu.memory_space<vmem>>, vector<8x256xf32>
    tpu.vector_store %arg4[%c0_58, %c0_59], %153 {strides = array<i32>} : memref<8x256xf32, #tpu.memory_space<vmem>>, vector<8x256xf32>,
    %cst_60 = arith.constant 6.000000e-01 : f32
    %155 = vector.broadcast %cst_60 : f32 to vector<8x128xf32>
    %156 = arith.cmpf oge, %0, %155 : vector<8x128xf32>
    %157 = arith.extui %156 : vector<8x128xi1> to vector<8x128xi32>
    %158 = arith.sitofp %157 : vector<8x128xi32> to vector<8x128xf32>
    %159 = arith.subf %126, %158 : vector<8x128xf32>
    %cst_61 = arith.constant -5.000000e-01 : f32
    %160 = vector.broadcast %cst_61 : f32 to vector<8x128xf32>
    %161 = arith.subf %14, %160 : vector<8x128xf32>
    %162 = arith.mulf %161, %127 : vector<8x128xf32>
    %cst_62 = arith.constant 1.500000e+00 : f32
    %163 = vector.broadcast %cst_62 : f32 to vector<8x128xf32>
    %164 = arith.subf %163, %14 : vector<8x128xf32>
    %165 = arith.mulf %164, %159 : vector<8x128xf32>
    %166 = arith.addf %162, %165 : vector<8x128xf32>
    %cst_63 = arith.constant -7.500000e-01 : f32
    %167 = vector.broadcast %cst_63 : f32 to vector<8x128xf32>
    %168 = arith.subf %16, %167 : vector<8x128xf32>
    %169 = arith.mulf %168, %134 : vector<8x128xf32>
    %cst_64 = arith.constant 7.500000e-01 : f32
    %170 = vector.broadcast %cst_64 : f32 to vector<8x128xf32>
    %171 = arith.subf %170, %16 : vector<8x128xf32>
    %172 = arith.mulf %171, %166 : vector<8x128xf32>
    %173 = arith.addf %169, %172 : vector<8x128xf32>
    %cst_65 = arith.constant -0.833333313 : f32
    %174 = vector.broadcast %cst_65 : f32 to vector<8x128xf32>
    %175 = arith.subf %18, %174 : vector<8x128xf32>
    %176 = arith.mulf %175, %141 : vector<8x128xf32>
    %cst_66 = arith.constant 5.000000e-01 : f32
    %177 = vector.broadcast %cst_66 : f32 to vector<8x128xf32>
    %178 = arith.subf %177, %18 : vector<8x128xf32>
    %179 = arith.mulf %178, %173 : vector<8x128xf32>
    %180 = arith.addf %176, %179 : vector<8x128xf32>
    %c0_67 = arith.constant 0 : index
    %c0_68 = arith.constant 0 : index
    %181 = vector.load %arg4[%c0_67, %c0_68] : memref<8x256xf32, #tpu.memory_space<vmem>>, vector<8x256xf32>
    %c512 = arith.constant 512 : index
    %c0_69 = arith.constant 0 : index
    %182 = vector.load %arg2[%c512, %c0_69] : memref<1152x256xbf16, #tpu.memory_space<vmem>>, vector<128x256xbf16>
    %183 = arith.truncf %180 : vector<8x128xf32> to vector<8x128xbf16>
    %cst_70 = arith.constant dense<0.000000e+00> : vector<8x256xf32>
    %184 = tpu.matmul %183, %182, %cst_70 {dimension_numbers = #tpu.dot_dimension_numbers<[1], [0], [0], [1], [0, 0, 1, 1], [], []>} : vector<8x128xbf16>, vector<128x256xbf16>, vector<8x256xf32> -> vector<8x256xf32>
    %185 = arith.addf %181, %184 : vector<8x256xf32>
    %c0_71 = arith.constant 0 : index
    %c0_72 = arith.constant 0 : index
    %186 = vector.load %arg4[%c0_71, %c0_72] : memref<8x256xf32, #tpu.memory_space<vmem>>, vector<8x256xf32>
    tpu.vector_store %arg4[%c0_71, %c0_72], %185 {strides = array<i32>} : memref<8x256xf32, #tpu.memory_space<vmem>>, vector<8x256xf32>,
    %cst_73 = arith.constant 1.000000e+00 : f32
    %187 = vector.broadcast %cst_73 : f32 to vector<8x128xf32>
    %188 = arith.cmpf oge, %0, %187 : vector<8x128xf32>
    %189 = arith.extui %188 : vector<8x128xi1> to vector<8x128xi32>
    %190 = arith.sitofp %189 : vector<8x128xi32> to vector<8x128xf32>
    %191 = arith.subf %158, %190 : vector<8x128xf32>
    %cst_74 = arith.constant 5.000000e-01 : f32
    %192 = vector.broadcast %cst_74 : f32 to vector<8x128xf32>
    %193 = arith.subf %14, %192 : vector<8x128xf32>
    %194 = arith.mulf %193, %159 : vector<8x128xf32>
    %cst_75 = arith.constant 2.500000e+00 : f32
    %195 = vector.broadcast %cst_75 : f32 to vector<8x128xf32>
    %196 = arith.subf %195, %14 : vector<8x128xf32>
    %197 = arith.mulf %196, %191 : vector<8x128xf32>
    %198 = arith.addf %194, %197 : vector<8x128xf32>
    %cst_76 = arith.constant -2.500000e-01 : f32
    %199 = vector.broadcast %cst_76 : f32 to vector<8x128xf32>
    %200 = arith.subf %16, %199 : vector<8x128xf32>
    %201 = arith.mulf %200, %166 : vector<8x128xf32>
    %cst_77 = arith.constant 1.250000e+00 : f32
    %202 = vector.broadcast %cst_77 : f32 to vector<8x128xf32>
    %203 = arith.subf %202, %16 : vector<8x128xf32>
    %204 = arith.mulf %203, %198 : vector<8x128xf32>
    %205 = arith.addf %201, %204 : vector<8x128xf32>
    %cst_78 = arith.constant -5.000000e-01 : f32
    %206 = vector.broadcast %cst_78 : f32 to vector<8x128xf32>
    %207 = arith.subf %18, %206 : vector<8x128xf32>
    %208 = arith.mulf %207, %173 : vector<8x128xf32>
    %cst_79 = arith.constant 0.833333313 : f32
    %209 = vector.broadcast %cst_79 : f32 to vector<8x128xf32>
    %210 = arith.subf %209, %18 : vector<8x128xf32>
    %211 = arith.mulf %210, %205 : vector<8x128xf32>
    %212 = arith.addf %208, %211 : vector<8x128xf32>
    %c0_80 = arith.constant 0 : index
    %c0_81 = arith.constant 0 : index
    %213 = vector.load %arg4[%c0_80, %c0_81] : memref<8x256xf32, #tpu.memory_space<vmem>>, vector<8x256xf32>
    %c640 = arith.constant 640 : index
    %c0_82 = arith.constant 0 : index
    %214 = vector.load %arg2[%c640, %c0_82] : memref<1152x256xbf16, #tpu.memory_space<vmem>>, vector<128x256xbf16>
    %215 = arith.truncf %212 : vector<8x128xf32> to vector<8x128xbf16>
    %cst_83 = arith.constant dense<0.000000e+00> : vector<8x256xf32>
    %216 = tpu.matmul %215, %214, %cst_83 {dimension_numbers = #tpu.dot_dimension_numbers<[1], [0], [0], [1], [0, 0, 1, 1], [], []>} : vector<8x128xbf16>, vector<128x256xbf16>, vector<8x256xf32> -> vector<8x256xf32>
    %217 = arith.addf %213, %216 : vector<8x256xf32>
    %c0_84 = arith.constant 0 : index
    %c0_85 = arith.constant 0 : index
    %218 = vector.load %arg4[%c0_84, %c0_85] : memref<8x256xf32, #tpu.memory_space<vmem>>, vector<8x256xf32>
    tpu.vector_store %arg4[%c0_84, %c0_85], %217 {strides = array<i32>} : memref<8x256xf32, #tpu.memory_space<vmem>>, vector<8x256xf32>,
    %cst_86 = arith.constant 1.400000e+00 : f32
    %219 = vector.broadcast %cst_86 : f32 to vector<8x128xf32>
    %220 = arith.cmpf oge, %0, %219 : vector<8x128xf32>
    %221 = arith.extui %220 : vector<8x128xi1> to vector<8x128xi32>
    %222 = arith.sitofp %221 : vector<8x128xi32> to vector<8x128xf32>
    %223 = arith.subf %190, %222 : vector<8x128xf32>
    %cst_87 = arith.constant 1.500000e+00 : f32
    %224 = vector.broadcast %cst_87 : f32 to vector<8x128xf32>
    %225 = arith.subf %14, %224 : vector<8x128xf32>
    %226 = arith.mulf %225, %191 : vector<8x128xf32>
    %cst_88 = arith.constant 3.500000e+00 : f32
    %227 = vector.broadcast %cst_88 : f32 to vector<8x128xf32>
    %228 = arith.subf %227, %14 : vector<8x128xf32>
    %229 = arith.mulf %228, %223 : vector<8x128xf32>
    %230 = arith.addf %226, %229 : vector<8x128xf32>
    %cst_89 = arith.constant 2.500000e-01 : f32
    %231 = vector.broadcast %cst_89 : f32 to vector<8x128xf32>
    %232 = arith.subf %16, %231 : vector<8x128xf32>
    %233 = arith.mulf %232, %198 : vector<8x128xf32>
    %cst_90 = arith.constant 1.750000e+00 : f32
    %234 = vector.broadcast %cst_90 : f32 to vector<8x128xf32>
    %235 = arith.subf %234, %16 : vector<8x128xf32>
    %236 = arith.mulf %235, %230 : vector<8x128xf32>
    %237 = arith.addf %233, %236 : vector<8x128xf32>
    %cst_91 = arith.constant -0.166666672 : f32
    %238 = vector.broadcast %cst_91 : f32 to vector<8x128xf32>
    %239 = arith.subf %18, %238 : vector<8x128xf32>
    %240 = arith.mulf %239, %205 : vector<8x128xf32>
    %cst_92 = arith.constant 1.16666663 : f32
    %241 = vector.broadcast %cst_92 : f32 to vector<8x128xf32>
    %242 = arith.subf %241, %18 : vector<8x128xf32>
    %243 = arith.mulf %242, %237 : vector<8x128xf32>
    %244 = arith.addf %240, %243 : vector<8x128xf32>
    %c0_93 = arith.constant 0 : index
    %c0_94 = arith.constant 0 : index
    %245 = vector.load %arg4[%c0_93, %c0_94] : memref<8x256xf32, #tpu.memory_space<vmem>>, vector<8x256xf32>
    %c768 = arith.constant 768 : index
    %c0_95 = arith.constant 0 : index
    %246 = vector.load %arg2[%c768, %c0_95] : memref<1152x256xbf16, #tpu.memory_space<vmem>>, vector<128x256xbf16>
    %247 = arith.truncf %244 : vector<8x128xf32> to vector<8x128xbf16>
    %cst_96 = arith.constant dense<0.000000e+00> : vector<8x256xf32>
    %248 = tpu.matmul %247, %246, %cst_96 {dimension_numbers = #tpu.dot_dimension_numbers<[1], [0], [0], [1], [0, 0, 1, 1], [], []>} : vector<8x128xbf16>, vector<128x256xbf16>, vector<8x256xf32> -> vector<8x256xf32>
    %249 = arith.addf %245, %248 : vector<8x256xf32>
    %c0_97 = arith.constant 0 : index
    %c0_98 = arith.constant 0 : index
    %250 = vector.load %arg4[%c0_97, %c0_98] : memref<8x256xf32, #tpu.memory_space<vmem>>, vector<8x256xf32>
    tpu.vector_store %arg4[%c0_97, %c0_98], %249 {strides = array<i32>} : memref<8x256xf32, #tpu.memory_space<vmem>>, vector<8x256xf32>,
    %cst_99 = arith.constant 1.800000e+00 : f32
    %251 = vector.broadcast %cst_99 : f32 to vector<8x128xf32>
    %252 = arith.cmpf oge, %0, %251 : vector<8x128xf32>
    %253 = arith.extui %252 : vector<8x128xi1> to vector<8x128xi32>
    %254 = arith.sitofp %253 : vector<8x128xi32> to vector<8x128xf32>
    %255 = arith.subf %222, %254 : vector<8x128xf32>
    %cst_100 = arith.constant 2.500000e+00 : f32
    %256 = vector.broadcast %cst_100 : f32 to vector<8x128xf32>
    %257 = arith.subf %14, %256 : vector<8x128xf32>
    %258 = arith.mulf %257, %223 : vector<8x128xf32>
    %cst_101 = arith.constant 4.500000e+00 : f32
    %259 = vector.broadcast %cst_101 : f32 to vector<8x128xf32>
    %260 = arith.subf %259, %14 : vector<8x128xf32>
    %261 = arith.mulf %260, %255 : vector<8x128xf32>
    %262 = arith.addf %258, %261 : vector<8x128xf32>
    %cst_102 = arith.constant 7.500000e-01 : f32
    %263 = vector.broadcast %cst_102 : f32 to vector<8x128xf32>
    %264 = arith.subf %16, %263 : vector<8x128xf32>
    %265 = arith.mulf %264, %230 : vector<8x128xf32>
    %cst_103 = arith.constant 2.250000e+00 : f32
    %266 = vector.broadcast %cst_103 : f32 to vector<8x128xf32>
    %267 = arith.subf %266, %16 : vector<8x128xf32>
    %268 = arith.mulf %267, %262 : vector<8x128xf32>
    %269 = arith.addf %265, %268 : vector<8x128xf32>
    %cst_104 = arith.constant 0.166666672 : f32
    %270 = vector.broadcast %cst_104 : f32 to vector<8x128xf32>
    %271 = arith.subf %18, %270 : vector<8x128xf32>
    %272 = arith.mulf %271, %237 : vector<8x128xf32>
    %cst_105 = arith.constant 1.500000e+00 : f32
    %273 = vector.broadcast %cst_105 : f32 to vector<8x128xf32>
    %274 = arith.subf %273, %18 : vector<8x128xf32>
    %275 = arith.mulf %274, %269 : vector<8x128xf32>
    %276 = arith.addf %272, %275 : vector<8x128xf32>
    %c0_106 = arith.constant 0 : index
    %c0_107 = arith.constant 0 : index
    %277 = vector.load %arg4[%c0_106, %c0_107] : memref<8x256xf32, #tpu.memory_space<vmem>>, vector<8x256xf32>
    %c896 = arith.constant 896 : index
    %c0_108 = arith.constant 0 : index
    %278 = vector.load %arg2[%c896, %c0_108] : memref<1152x256xbf16, #tpu.memory_space<vmem>>, vector<128x256xbf16>
    %279 = arith.truncf %276 : vector<8x128xf32> to vector<8x128xbf16>
    %cst_109 = arith.constant dense<0.000000e+00> : vector<8x256xf32>
    %280 = tpu.matmul %279, %278, %cst_109 {dimension_numbers = #tpu.dot_dimension_numbers<[1], [0], [0], [1], [0, 0, 1, 1], [], []>} : vector<8x128xbf16>, vector<128x256xbf16>, vector<8x256xf32> -> vector<8x256xf32>
    %281 = arith.addf %277, %280 : vector<8x256xf32>
    %c0_110 = arith.constant 0 : index
    %c0_111 = arith.constant 0 : index
    %282 = vector.load %arg4[%c0_110, %c0_111] : memref<8x256xf32, #tpu.memory_space<vmem>>, vector<8x256xf32>
    tpu.vector_store %arg4[%c0_110, %c0_111], %281 {strides = array<i32>} : memref<8x256xf32, #tpu.memory_space<vmem>>, vector<8x256xf32>,
    %cst_112 = arith.constant 2.200000e+00 : f32
    %283 = vector.broadcast %cst_112 : f32 to vector<8x128xf32>
    %284 = arith.cmpf oge, %0, %283 : vector<8x128xf32>
    %285 = arith.extui %284 : vector<8x128xi1> to vector<8x128xi32>
    %286 = arith.sitofp %285 : vector<8x128xi32> to vector<8x128xf32>
    %287 = arith.subf %254, %286 : vector<8x128xf32>
    %cst_113 = arith.constant 3.500000e+00 : f32
    %288 = vector.broadcast %cst_113 : f32 to vector<8x128xf32>
    %289 = arith.subf %14, %288 : vector<8x128xf32>
    %290 = arith.mulf %289, %255 : vector<8x128xf32>
    %cst_114 = arith.constant 5.500000e+00 : f32
    %291 = vector.broadcast %cst_114 : f32 to vector<8x128xf32>
    %292 = arith.subf %291, %14 : vector<8x128xf32>
    %293 = arith.mulf %292, %287 : vector<8x128xf32>
    %294 = arith.addf %290, %293 : vector<8x128xf32>
    %cst_115 = arith.constant 1.250000e+00 : f32
    %295 = vector.broadcast %cst_115 : f32 to vector<8x128xf32>
    %296 = arith.subf %16, %295 : vector<8x128xf32>
    %297 = arith.mulf %296, %262 : vector<8x128xf32>
    %cst_116 = arith.constant 2.750000e+00 : f32
    %298 = vector.broadcast %cst_116 : f32 to vector<8x128xf32>
    %299 = arith.subf %298, %16 : vector<8x128xf32>
    %300 = arith.mulf %299, %294 : vector<8x128xf32>
    %301 = arith.addf %297, %300 : vector<8x128xf32>
    %cst_117 = arith.constant 5.000000e-01 : f32
    %302 = vector.broadcast %cst_117 : f32 to vector<8x128xf32>
    %303 = arith.subf %18, %302 : vector<8x128xf32>
    %304 = arith.mulf %303, %269 : vector<8x128xf32>
    %cst_118 = arith.constant 1.83333337 : f32
    %305 = vector.broadcast %cst_118 : f32 to vector<8x128xf32>
    %306 = arith.subf %305, %18 : vector<8x128xf32>
    %307 = arith.mulf %306, %301 : vector<8x128xf32>
    %308 = arith.addf %304, %307 : vector<8x128xf32>
    %c0_119 = arith.constant 0 : index
    %c0_120 = arith.constant 0 : index
    %309 = vector.load %arg4[%c0_119, %c0_120] : memref<8x256xf32, #tpu.memory_space<vmem>>, vector<8x256xf32>
    %c1024 = arith.constant 1024 : index
    %c0_121 = arith.constant 0 : index
    %310 = vector.load %arg2[%c1024, %c0_121] : memref<1152x256xbf16, #tpu.memory_space<vmem>>, vector<128x256xbf16>
    %311 = arith.truncf %308 : vector<8x128xf32> to vector<8x128xbf16>
    %cst_122 = arith.constant dense<0.000000e+00> : vector<8x256xf32>
    %312 = tpu.matmul %311, %310, %cst_122 {dimension_numbers = #tpu.dot_dimension_numbers<[1], [0], [0], [1], [0, 0, 1, 1], [], []>} : vector<8x128xbf16>, vector<128x256xbf16>, vector<8x256xf32> -> vector<8x256xf32>
    %313 = arith.addf %309, %312 : vector<8x256xf32>
    %c0_123 = arith.constant 0 : index
    %c0_124 = arith.constant 0 : index
    %314 = vector.load %arg4[%c0_123, %c0_124] : memref<8x256xf32, #tpu.memory_space<vmem>>, vector<8x256xf32>
    tpu.vector_store %arg4[%c0_123, %c0_124], %313 {strides = array<i32>} : memref<8x256xf32, #tpu.memory_space<vmem>>, vector<8x256xf32>,
    %c0_125 = arith.constant 0 : index
    %c0_126 = arith.constant 0 : index
    %315 = vector.load %arg4[%c0_125, %c0_126] : memref<8x256xf32, #tpu.memory_space<vmem>>, vector<8x256xf32>
    %316 = vector.extract_strided_slice %315 {offsets = [0, 0], sizes = [8, 128], strides = [1, 1]} : vector<8x256xf32> to vector<8x128xf32>
    %317 = vector.extract_strided_slice %315 {offsets = [0, 128], sizes = [8, 128], strides = [1, 1]} : vector<8x256xf32> to vector<8x128xf32>
    %cst_127 = arith.constant 0.000000e+00 : f32
    %318 = vector.broadcast %cst_127 : f32 to vector<8x128xf32>
    %319 = arith.maximumf %317, %318 : vector<8x128xf32>
    %320 = math.absf %317 : vector<8x128xf32>
    %cst_128 = arith.constant 0.000000e+00 : f32
    %321 = vector.broadcast %cst_128 : f32 to vector<8x128xf32>
    %322 = arith.subf %321, %320 : vector<8x128xf32>
    %323 = math.exp %322 : vector<8x128xf32>
    %324 = math.log1p %323 : vector<8x128xf32>
    %325 = arith.addf %319, %324 : vector<8x128xf32>
    %c0_129 = arith.constant 0 : index
    %c0_130 = arith.constant 0 : index
    %326 = vector.load %arg3[%c0_129, %c0_130] : memref<8x384xf32, #tpu.memory_space<vmem>>, vector<8x128xf32>
    tpu.vector_store %arg3[%c0_129, %c0_130], %316 {strides = array<i32>} : memref<8x384xf32, #tpu.memory_space<vmem>>, vector<8x128xf32>,
    %c0_131 = arith.constant 0 : index
    %c128_132 = arith.constant 128 : index
    %327 = vector.load %arg3[%c0_131, %c128_132] : memref<8x384xf32, #tpu.memory_space<vmem>>, vector<8x128xf32>
    tpu.vector_store %arg3[%c0_131, %c128_132], %316 {strides = array<i32>} : memref<8x384xf32, #tpu.memory_space<vmem>>, vector<8x128xf32>,
    %c0_133 = arith.constant 0 : index
    %c256_134 = arith.constant 256 : index
    %328 = vector.load %arg3[%c0_133, %c256_134] : memref<8x384xf32, #tpu.memory_space<vmem>>, vector<8x128xf32>
    tpu.vector_store %arg3[%c0_133, %c256_134], %325 {strides = array<i32>} : memref<8x384xf32, #tpu.memory_space<vmem>>, vector<8x128xf32>,
    return
  }
  func.func @transform_0(%arg0: i32) -> (i32, i32) {
    %c0_i32 = arith.constant 0 : i32
    %c0_i32_0 = arith.constant 0 : i32
    return %arg0, %c0_i32 : i32, i32
  }
  func.func @transform_1(%arg0: i32) -> (i32, i32) {
    %c0_i32 = arith.constant 0 : i32
    %c0_i32_0 = arith.constant 0 : i32
    %c0_i32_1 = arith.constant 0 : i32
    return %c0_i32, %c0_i32_0 : i32, i32
  }
  func.func @transform_2(%arg0: i32) -> (i32, i32) {
    %c0_i32 = arith.constant 0 : i32
    %c0_i32_0 = arith.constant 0 : i32
    return %arg0, %c0_i32 : i32, i32
  }
}

</mosaic_0001>

<bundles_post_ra>
// kernel: tpu_custom_call.1
= control target key start
LH: loop header
LB: loop body
LE: loop exit
PB: predicated region body
PF: predicated region fallthrough
CT: control target
= control target key end

     0   :  { %7 = vsyncpa [#allocation4], 0  ;;  %s2309_s0 = inlined_call_operand.hbm [shape: f32[8,128], index: 0, kind: input, shape index: {}]   ;;  %s2310_s1 = inlined_call_operand.hbm [shape: bf16[1152,256], index: 1, kind: input, shape index: {}]   ;;  %s2311_s2 = inlined_call_operand.hbm [shape: f32[8,384], index: 2, kind: output, shape index: {}]  }
   0x1   :  { %8 = vsyncpa [#allocation7], 0 }
   0x2   :  { %9 = vsyncpa [#allocation5], 0  ;;  %s2072_s9 = smov [#allocation3]   ;;  %s2073_s11 = smov [#allocation6]  }
   0x3   :  { %s16_s10 = sshll.u32 %s2072_s9, 4  ;;  %s25_s12 = sshll.u32 %s2073_s11, 4  ;;  %s17_s10 = int_to_ptr.vmem [resolvable:$true] %s16_s10  ;;  %s2094_s12 = int_to_ptr.vmem [resolvable:$true] %s25_s12 }
   0x4   :  { %s2000_s15 = scalar_lea.hbm %s2309_s0, 128 }
   0x5   :  { %p2001_p0 = scmp.ne.s32.totalorder %s2309_s0, %s2000_s15  ;;  %p2004_p1 = scmp.lt.u32.totalorder %s2000_s15, %s2309_s0 }
   0x7   :  { %p2006_p2 = pnand %p2004_p1, %p2001_p0 }
   0x9   :  { %2009 = shalt.err (!%p2006_p2)
}
   0xa   :  { %s2010_s20 = scalar_lea.vmem %s17_s10, 128  ;;  %p2015_p4 = scmp.lt.s32.totalorder %s17_s10, %s17_s10 }
   0xb   :  { %p2011_p3 = scmp.ne.s32.totalorder %s17_s10, %s2010_s20  ;;  %p2016_p5 = scmp.lt.s32.totalorder %s2010_s20, %s2010_s20 }
   0xd   :  { %p2017_p6 = por %p2016_p5, %p2015_p4 }
   0xf   :  { %p2018_p7 = pnand %p2017_p6, %p2011_p3 }
  0x11   :  { %2021 = shalt.err (!%p2018_p7)
}
  0x12   :  { %19 = dma.hbm_to_vmem [thread:$0]  %s2309_s0, 128, %s17_s10, [#allocation4]  }
  0x13   :  { %s2022_s25 = scalar_lea.hbm %s2310_s1, 18432 }
  0x14   :  { %p2023_p8 = scmp.ne.s32.totalorder %s2310_s1, %s2022_s25  ;;  %p2026_p9 = scmp.lt.u32.totalorder %s2022_s25, %s2310_s1 }
  0x16   :  { %p2028_p10 = pnand %p2026_p9, %p2023_p8 }
  0x18   :  { %2031 = shalt.err (!%p2028_p10)
}
  0x19   :  { %s2032_s30 = scalar_lea.vmem %s2094_s12, 18432  ;;  %p2037_p12 = scmp.lt.s32.totalorder %s2094_s12, %s2094_s12 }
  0x1a   :  { %p2033_p11 = scmp.ne.s32.totalorder %s2094_s12, %s2032_s30  ;;  %p2038_p13 = scmp.lt.s32.totalorder %s2032_s30, %s2032_s30 }
  0x1c   :  { %p2039_p0 = por %p2038_p13, %p2037_p12 }
  0x1e   :  { %p2040_p1 = pnand %p2039_p0, %p2033_p11 }
  0x20   :  { %2043 = shalt.err (!%p2040_p1)
}
  0x21   :  { %s2074_s0 = smov 128   ;;  %s2075_s3 = smov 8  }
  0x22   :  { %31 = dma.hbm_to_vmem [thread:$0]  %s2310_s1, 18432, %s2094_s12, [#allocation7], %s2074_s0, %s2074_s0, %s2075_s3  }
  0x23   :  { %2066 = dma.done.wait [#allocation4], 128  }
  0x24   :  { %2067 = vsyncadd [#allocation4], 4294967168 }
  0x25   :  { %2068 = dma.done.wait [#allocation7], 18432  }
  0x26   :  { %2069 = vsyncadd [#allocation7], 4294948864  ;;  %v2076_v0 = vmov 0   ;;  %v1778_v1 = vld [vmem:[#allocation6 + $0x4] ss:$8 sps:$4 sm:$0xff]   ;;  %v2127_v30 = vld [vmem:[#allocation3] sm:$0xff] }
  0x27   :  { %174 = vmatprep.mubr.bf16.mxu1 %v2076_v0  ;;  %857 = vmatprep.mubr.bf16.mxu0 %v2076_v0  ;;  %v1780_v2 = vld [vmem:[#allocation6 + $0x204] ss:$8 sps:$4 sm:$0xff]   ;;  %v1782_v3 = vld [vmem:[#allocation6] ss:$8 sps:$4 sm:$0xff]   ;;  %v1784_v5 = vld [vmem:[#allocation6 + $0x14] ss:$8 sps:$4 sm:$0xff]  }
  0x28   :  { %142 = vmatprep.subr.bf16.mxu1 %v1778_v1  ;;  %v1783_v4 = vld [vmem:[#allocation6 + $0x200] ss:$8 sps:$4 sm:$0xff]   ;;  %825 = vmatprep.subr.bf16.mxu0 %v1780_v2  ;;  %v1786_v6 = vld [vmem:[#allocation6 + $0x214] ss:$8 sps:$4 sm:$0xff]   ;;  %v1788_v7 = vld [vmem:[#allocation6 + $0x10] ss:$8 sps:$4 sm:$0xff]  }
  0x29   :  { %143 = vmatpush1.bf16.msra.mxu1 %v1782_v3  ;;  %826 = vmatpush1.bf16.msra.mxu0 %v1783_v4  ;;  %v1789_v8 = vld [vmem:[#allocation6 + $0x210] ss:$8 sps:$4 sm:$0xff]   ;;  %v1790_v9 = vld [vmem:[#allocation6 + $0x24] ss:$8 sps:$4 sm:$0xff]   ;;  %v1794_v11 = vld [vmem:[#allocation6 + $0x20] ss:$8 sps:$4 sm:$0xff]  }
  0x2a   :  { %144 = vmatprep.subr.bf16.mxu1 %v1784_v5  ;;  %827 = vmatprep.subr.bf16.mxu0 %v1786_v6  ;;  %v1792_v10 = vld [vmem:[#allocation6 + $0x224] ss:$8 sps:$4 sm:$0xff]   ;;  %v1795_v12 = vld [vmem:[#allocation6 + $0x220] ss:$8 sps:$4 sm:$0xff]   ;;  %v1796_v13 = vld [vmem:[#allocation6 + $0x34] ss:$8 sps:$4 sm:$0xff]  }
  0x2b   :  { %v1798_v14 = vld [vmem:[#allocation6 + $0x234] ss:$8 sps:$4 sm:$0xff]   ;;  %v1800_v15 = vld [vmem:[#allocation6 + $0x30] ss:$8 sps:$4 sm:$0xff]   ;;  %v1802_v17 = vld [vmem:[#allocation6 + $0x44] ss:$8 sps:$4 sm:$0xff]  }
  0x2c   :  { %v1801_v16 = vld [vmem:[#allocation6 + $0x230] ss:$8 sps:$4 sm:$0xff]   ;;  %v1804_v18 = vld [vmem:[#allocation6 + $0x244] ss:$8 sps:$4 sm:$0xff]   ;;  %v1806_v19 = vld [vmem:[#allocation6 + $0x40] ss:$8 sps:$4 sm:$0xff]  }
  0x2d   :  { %145 = vmatpush1.bf16.msra.mxu1 %v1788_v7  ;;  %828 = vmatpush1.bf16.msra.mxu0 %v1789_v8  ;;  %v1807_v20 = vld [vmem:[#allocation6 + $0x240] ss:$8 sps:$4 sm:$0xff]   ;;  %v1808_v21 = vld [vmem:[#allocation6 + $0x54] ss:$8 sps:$4 sm:$0xff]   ;;  %v1812_v23 = vld [vmem:[#allocation6 + $0x50] ss:$8 sps:$4 sm:$0xff]  }
  0x2e   :  { %146 = vmatprep.subr.bf16.mxu1 %v1790_v9  ;;  %829 = vmatprep.subr.bf16.mxu0 %v1792_v10  ;;  %v1810_v22 = vld [vmem:[#allocation6 + $0x254] ss:$8 sps:$4 sm:$0xff]   ;;  %v1813_v24 = vld [vmem:[#allocation6 + $0x250] ss:$8 sps:$4 sm:$0xff]   ;;  %v1814_v25 = vld [vmem:[#allocation6 + $0x64] ss:$8 sps:$4 sm:$0xff]  }
  0x2f   :  { %v1816_v26 = vld [vmem:[#allocation6 + $0x264] ss:$8 sps:$4 sm:$0xff]   ;;  %v1818_v27 = vld [vmem:[#allocation6 + $0x60] ss:$8 sps:$4 sm:$0xff]   ;;  %v1820_v29 = vld [vmem:[#allocation6 + $0x74] ss:$8 sps:$4 sm:$0xff]  }
  0x30   :  { %v1819_v28 = vld [vmem:[#allocation6 + $0x260] ss:$8 sps:$4 sm:$0xff]   ;;  %v1822_v31 = vld [vmem:[#allocation6 + $0x274] ss:$8 sps:$4 sm:$0xff]   ;;  %v40_v32 = vmul.f32 0.5, %v2127_v30  ;;  %v2131_v33 = vmul.f32 2.5, %v2127_v30 }
  0x31   :  { %147 = vmatpush1.bf16.msra.mxu1 %v1794_v11  ;;  %830 = vmatpush1.bf16.msra.mxu0 %v1795_v12  ;;  %v1824_v34 = vld [vmem:[#allocation6 + $0x70] ss:$8 sps:$4 sm:$0xff]   ;;  %vm204_vm0 = vcmp.ge.f32.partialorder %v2127_v30, -1.0  ;;  %vm218_vm1 = vcmp.ge.f32.partialorder %v2127_v30, -0.6  ;;  %v2136_v38 = vmul.f32 1.25, %v2127_v30 }
  0x32   :  { %148 = vmatprep.subr.bf16.mxu1 %v1796_v13  ;;  %831 = vmatprep.subr.bf16.mxu0 %v1798_v14  ;;  %v1825_v35 = vld [vmem:[#allocation6 + $0x270] ss:$8 sps:$4 sm:$0xff]   ;;  %v1828_v36 = vld [vmem:[#allocation6 + $0x84] ss:$8 sps:$4 sm:$0xff]   ;;  %1994 = vtanh.f32 %v40_v32  ;;  %v2077_v39 = vmov 0.0   ;;  %v1602_v44 = vadd.f32 2.5, %v2131_v33 }
  0x33   :  { %v1831_v37 = vld [vmem:[#allocation6 + $0x284] ss:$8 sps:$4 sm:$0xff]   ;;  %v2139_v40 = vsel %vm204_vm0, 1.0, %v2077_v39  ;;  %v1581_v41 = vsel %vm218_vm1, 1.0, %v2077_v39  ;;  %v2143_v42 = vmul.f32 0.8333333, %v2127_v30 }
  0x34   :  { %v2146_v43 = vsub.f32 %v2139_v40, %v1581_v41  ;;  %vm381_vm2 = vcmp.ge.f32.partialorder %v2127_v30, -0.2  ;;  %v387_v46 = vsub.f32 -0.5, %v2131_v33  ;;  %vm544_vm3 = vcmp.ge.f32.partialorder %v2127_v30, 0.2  ;;  %s2078_s1 = smov [#allocation8]  }
  0x35   :  { %149 = vmatpush1.bf16.msra.mxu1 %v1800_v15  ;;  %832 = vmatpush1.bf16.msra.mxu0 %v1801_v16  ;;  %v1601_v45 = vsel %vm381_vm2, 1.0, %v2077_v39  ;;  %v1622_v47 = vadd.f32 1.5, %v2131_v33  ;;  %v1621_v50 = vsel %vm544_vm3, 1.0, %v2077_v39  ;;  %v550_v51 = vsub.f32 0.5, %v2131_v33  ;;  %s1548_s6 = sshll.u32 %s2078_s1, 4  ;;  %s1549_s6 = int_to_ptr.vmem [resolvable:$true] %s1548_s6 }
  0x36   :  { %150 = vmatprep.subr.bf16.mxu1 %v1802_v17  ;;  %833 = vmatprep.subr.bf16.mxu0 %v1804_v18  ;;  %v384_v48 = vsub.f32 %v1581_v41, %v1601_v45  ;;  %v386_v49 = vmul.f32 %v1602_v44, %v2146_v43  ;;  %v547_v52 = vsub.f32 %v1601_v45, %v1621_v50  ;;  %v1623_v53 = vadd.f32 1.25, %v2136_v38  ;;  %v1832_v45 = vld [vmem:[#allocation6 + $0x90] ss:$8 sps:$4 sm:$0xff]   ;;  %s2044_s7 = scalar_lea.vmem %s1549_s6, 384  ;;  %p2049_p3 = scmp.lt.s32.totalorder %s1549_s6, %s1549_s6 }
  0x37   :  { %v555_v54 = vsub.f32 0.25, %v2136_v38  ;;  %vm707_vm4 = vcmp.ge.f32.partialorder %v2127_v30, 0.6  ;;  %v1642_v58 = vadd.f32 0.5, %v2131_v33  ;;  %v713_v61 = vsub.f32 1.5, %v2131_v33  ;;  %p2045_p2 = scmp.ne.s32.totalorder %s1549_s6, %s2044_s7  ;;  %p2050_p4 = scmp.lt.s32.totalorder %s2044_s7, %s2044_s7 }
  0x38   :  { %v388_v55 = vmul.f32 %v387_v46, %v384_v48  ;;  %v549_v56 = vmul.f32 %v1622_v47, %v384_v48  ;;  %v2161_v57 = vsel %vm707_vm4, 1.0, %v2077_v39  ;;  %v551_v59 = vmul.f32 %v550_v51, %v547_v52  ;;  %v1837_v46 = vld [vmem:[#allocation6 + $0x294] ss:$8 sps:$4 sm:$0xff]  }
  0x39   :  { %151 = vmatpush1.bf16.msra.mxu1 %v1806_v19  ;;  %834 = vmatpush1.bf16.msra.mxu0 %v1807_v20  ;;  %v2165_v60 = vsub.f32 %v1621_v50, %v2161_v57  ;;  %v1643_v62 = vadd.f32 0.75, %v2136_v38  ;;  %v712_v1 = vmul.f32 %v1642_v58, %v547_v52  ;;  %v718_v4 = vsub.f32 0.75, %v2136_v38  ;;  %p2051_p5 = por %p2050_p4, %p2049_p3 }
  0x3a   :  { %152 = vmatprep.subr.bf16.mxu1 %v1808_v21  ;;  %835 = vmatprep.subr.bf16.mxu0 %v1810_v22  ;;  %v2169_v63 = vadd.f32 %v388_v55, %v386_v49  ;;  %v552_v2 = vadd.f32 %v551_v59, %v549_v56  ;;  %vm195_vm5 = vcmp.ge.f32.partialorder %v2127_v30, -1.4  ;;  %v1644_v6 = vadd.f32 0.8333333, %v2143_v42  ;;  %v1840_v49 = vld [vmem:[#allocation6 + $0xa4] ss:$8 sps:$4 sm:$0xff]  }
  0x3b   :  { %v714_v3 = vmul.f32 %v713_v61, %v2165_v60  ;;  %vm188_vm6 = vcmp.ge.f32.partialorder %v2127_v30, -2.2  ;;  %v723_v14 = vsub.f32 0.5, %v2143_v42  ;;  %v1576_v16 = vsel %vm195_vm5, 1.0, %v2077_v39  ;;  %v1835_v55 = vld [vmem:[#allocation6 + $0x290] ss:$8 sps:$4 sm:$0xff]   ;;  %p2052_p6 = pnand %p2051_p5, %p2045_p2 }
  0x3c   :  { %v554_v5 = vmul.f32 %v1623_v53, %v2169_v63  ;;  %v1995_v7 = vpop.eup %1994  ;;  %v556_v8 = vmul.f32 %v555_v54, %v552_v2  ;;  %v717_v10 = vmul.f32 %v1643_v62, %v552_v2  ;;  %v1574_v17 = vsel %vm188_vm6, 1.0, %v2077_v39  ;;  %v1838_v56 = vld [vmem:[#allocation6 + $0xa0] ss:$8 sps:$4 sm:$0xff]   ;;  %v1843_v59 = vld [vmem:[#allocation6 + $0x2a4] ss:$8 sps:$4 sm:$0xff]  }
  0x3d   :  { %153 = vmatpush1.bf16.msra.mxu1 %v1812_v23  ;;  %836 = vmatpush1.bf16.msra.mxu0 %v1813_v24  ;;  %v2176_v9 = vadd.f32 %v714_v3, %v712_v1  ;;  %v42_v11 = vmul.f32 0.5, %v1995_v7  ;;  %vm191_vm7 = vcmp.ge.f32.partialorder %v2127_v30, -1.8  ;;  %vm870_vm8 = vcmp.ge.f32.partialorder %v2127_v30, 1.0  ;;  %v1826_v23 = vld [vmem:[#allocation6 + $0x80] ss:$8 sps:$4 sm:$0xff]  }
  0x3e   :  { %154 = vmatprep.subr.bf16.mxu1 %v1814_v25  ;;  %837 = vmatprep.subr.bf16.mxu0 %v1816_v26  ;;  %v2179_v12 = vadd.f32 %v556_v8, %v554_v5  ;;  %v1575_v21 = vsel %vm191_vm7, 1.0, %v2077_v39  ;;  %v1577_v22 = vadd.f32 5.5, %v2131_v33  ;;  %v1579_v32 = vadd.f32 4.5, %v2131_v33 }
  0x3f   :  { %v719_v13 = vmul.f32 %v718_v4, %v2176_v9  ;;  %v43_v15 = vadd.f32 0.5, %v42_v11  ;;  %v194_v25 = vsub.f32 %v1574_v17, %v1575_v21  ;;  %v198_v26 = vsub.f32 %v1575_v21, %v1576_v16  ;;  %v1841_v4 = vld [vmem:[#allocation6 + $0x2a0] ss:$8 sps:$4 sm:$0xff]   ;;  %v1849_v11 = vld [vmem:[#allocation6 + $0x2b4] ss:$8 sps:$4 sm:$0xff]  }
  0x40   :  { %v722_v19 = vmul.f32 %v1644_v6, %v2179_v12  ;;  %v1582_v41 = vadd.f32 3.5, %v2131_v33  ;;  %v224_v48 = vsub.f32 -1.5, %v2131_v33  ;;  %v1662_v58 = vadd.f32 -0.5, %v2131_v33  ;;  %v1850_v21 = vld [vmem:[#allocation6 + $0xc0] ss:$8 sps:$4 sm:$0xff]  }
  0x41   :  { %155 = vmatpush1.bf16.msra.mxu1 %v1818_v27  ;;  %838 = vmatpush1.bf16.msra.mxu0 %v1819_v28  ;;  %v2185_v18 = vadd.f32 %v719_v13, %v717_v10  ;;  %v44_v20 = vmul.f32 %v43_v15, %v2127_v30  ;;  %v201_v27 = vsub.f32 -3.5, %v2131_v33  ;;  %v209_v50 = vmul.f32 %v1579_v32, %v198_v26  ;;  %v1844_v10 = vld [vmem:[#allocation6 + $0xb0] ss:$8 sps:$4 sm:$0xff]   ;;  %v1852_v15 = vld [vmem:[#allocation6 + $0xc4] ss:$8 sps:$4 sm:$0xff]  }
  0x42   :  { %156 = vmatprep.subr.bf16.mxu1 %v1820_v29  ;;  %839 = vmatprep.subr.bf16.mxu0 %v1822_v31  ;;  %v207_v29 = vsub.f32 %v1576_v16, %v2139_v40  ;;  %v1834_v31 = vld [vmem:[#allocation6 + $0x94] ss:$8 sps:$4 sm:$0xff]   ;;  %v200_v40 = vmul.f32 %v1577_v22, %v194_v25  ;;  %v225_v54 = vmul.f32 %v224_v48, %v2146_v43  ;;  %v1580_v62 = vadd.f32 2.75, %v2136_v38  ;;  %v1855_v22 = vld [vmem:[#allocation6 + $0x2c4] ss:$8 sps:$4 sm:$0xff]  }
  0x43   :  { %v724_v24 = vmul.f32 %v723_v14, %v2185_v18  ;;  %v61_v28 = vpack.c.bf16 %v44_v20, %v44_v20  ;;  %v202_v47 = vmul.f32 %v201_v27, %v198_v26  ;;  %v876_v1 = vsub.f32 2.5, %v2131_v33  ;;  %v1847_v14 = vld [vmem:[#allocation6 + $0x2b0] ss:$8 sps:$4 sm:$0xff]   ;;  %v1858_v32 = vld [vmem:[#allocation6 + $0xd4] ss:$8 sps:$4 sm:$0xff]  }
  0x44   :  { %v223_v53 = vmul.f32 %v1582_v41, %v207_v29  ;;  %v215_v43 = vsub.f32 -1.25, %v2136_v38  ;;  %v1583_v3 = vadd.f32 2.25, %v2136_v38  ;;  %v229_v6 = vsub.f32 -0.75, %v2136_v38 }
  0x45   :  { %157 = vmatpush1.bf16.msra.mxu1 %v1824_v34  ;;  %840 = vmatpush1.bf16.msra.mxu0 %v1825_v35  ;;  %v210_v34 = vsub.f32 -2.5, %v2131_v33  ;;  %v725_v35 = vadd.f32 %v724_v24, %v722_v19  ;;  %v203_v61 = vadd.f32 %v202_v47, %v200_v40  ;;  %v875_v7 = vmul.f32 %v1662_v58, %v2165_v60 }
  0x46   :  { %336 = vmatprep.subr.bf16.mxu1 %v1828_v36  ;;  %988 = vmatprep.subr.bf16.mxu0 %v1831_v37  ;;  %v1829_v36 = vld [vmem:[#allocation6 + $0x280] ss:$8 sps:$4 sm:$0xff]   ;;  %v2201_v37 = vsel %vm870_vm8, 1.0, %v2077_v39  ;;  %v226_v5 = vadd.f32 %v225_v54, %v223_v53  ;;  %v1663_v19 = vadd.f32 0.25, %v2136_v38  ;;  %v1682_v20 = vadd.f32 -1.5, %v2131_v33 }
  0x47   :  { %v744_v44 = vpack.c.bf16 %v725_v35, %v725_v35  ;;  %v211_v51 = vmul.f32 %v210_v34, %v207_v29  ;;  %v873_v52 = vsub.f32 %v2161_v57, %v2201_v37  ;;  %v1846_v57 = vld [vmem:[#allocation6 + $0xb4] ss:$8 sps:$4 sm:$0xff]   ;;  %v214_v13 = vmul.f32 %v1580_v62, %v203_v61  ;;  %v1859_v61 = vld [vmem:[#allocation6 + $0x2d0] ss:$8 sps:$4 sm:$0xff]   ;;  %v1862_v62 = vld [vmem:[#allocation6 + $0xe0] ss:$8 sps:$4 sm:$0xff]  }
  0x48   :  { %175 = vmatmul.mubr.bf16.vlgmr.msra.gmra.mrb[0].mxu1 %v61_v28  ;;  %v881_v24 = vsub.f32 1.25, %v2136_v38  ;;  %v1603_v25 = vadd.f32 1.75, %v2136_v38  ;;  %v392_v26 = vsub.f32 -0.25, %v2136_v38  ;;  %vm1033_vm9 = vcmp.ge.f32.partialorder %v2127_v30, 1.4 }
  0x49   :  { %337 = vmatpush1.bf16.msra.mxu1 %v1826_v23  ;;  %368 = vmatprep.mubr.bf16.mxu1 %v2076_v0  ;;  %v212_v2 = vadd.f32 %v211_v51, %v209_v50  ;;  %v877_v8 = vmul.f32 %v876_v1, %v873_v52  ;;  %v230_v23 = vmul.f32 %v229_v6, %v226_v5  ;;  %v1039_v27 = vsub.f32 3.5, %v2131_v33  ;;  %v1867_v6 = vld [vmem:[#allocation6 + $0x2e4] ss:$8 sps:$4 sm:$0xff]  }
  0x4a   :  { %338 = vmatprep.subr.bf16.mxu1 %v1834_v31  ;;  %858 = vmatmul.mubr.bf16.vlgmr.msra.gmra.mrb[0].mxu0 %v744_v44  ;;  %v1584_v28 = vadd.f32 1.8333334, %v2143_v42  ;;  %v234_v29 = vsub.f32 -0.5, %v2143_v42  ;;  %v2227_v31 = vsel %vm1033_vm9, 1.0, %v2077_v39  ;;  %v1683_v41 = vadd.f32 -0.25, %v2136_v38 }
  0x4b   :  { %989 = vmatpush1.bf16.msra.mxu0 %v1829_v36  ;;  %1020 = vmatprep.mubr.bf16.mxu0 %v2076_v0  ;;  %v216_v16 = vmul.f32 %v215_v43, %v212_v2  ;;  %v228_v17 = vmul.f32 %v1583_v3, %v212_v2  ;;  %v878_v60 = vadd.f32 %v877_v8, %v875_v7  ;;  %v1853_v44 = vld [vmem:[#allocation6 + $0x2c0] ss:$8 sps:$4 sm:$0xff]   ;;  %v1702_v48 = vadd.f32 -2.5, %v2131_v33 }
  0x4c   :  { %990 = vmatprep.subr.bf16.mxu0 %v1837_v46  ;;  %v1036_v35 = vsub.f32 %v2201_v37, %v2227_v31  ;;  %v1038_v36 = vmul.f32 %v1682_v20, %v873_v52  ;;  %v880_v40 = vmul.f32 %v1663_v19, %v2176_v9  ;;  %v391_v50 = vmul.f32 %v1603_v25, %v226_v5  ;;  %v1864_v52 = vld [vmem:[#allocation6 + $0xe4] ss:$8 sps:$4 sm:$0xff]  }
  0x4d   :  { %339 = vmatpush1.bf16.msra.mxu1 %v1832_v45  ;;  %v217_v34 = vadd.f32 %v216_v16, %v214_v13  ;;  %v1856_v45 = vld [vmem:[#allocation6 + $0xd0] ss:$8 sps:$4 sm:$0xff]   ;;  %v2232_v46 = vadd.f32 %v230_v23, %v228_v17  ;;  %v882_v47 = vmul.f32 %v881_v24, %v878_v60  ;;  %v393_v51 = vmul.f32 %v392_v26, %v2169_v63 }
  0x4e   :  { %340 = vmatprep.subr.bf16.mxu1 %v1840_v49  ;;  %v1861_v49 = vld [vmem:[#allocation6 + $0x2d4] ss:$8 sps:$4 sm:$0xff]   ;;  %v1040_v53 = vmul.f32 %v1039_v27, %v1036_v35  ;;  %v1044_v37 = vsub.f32 1.75, %v2136_v38  ;;  %v1664_v54 = vadd.f32 0.5, %v2143_v42  ;;  %v886_v9 = vsub.f32 0.8333333, %v2143_v42 }
  0x4f   :  { %991 = vmatpush1.bf16.msra.mxu0 %v1835_v55  ;;  %v2239_v55 = vmul.f32 %v1702_v48, %v1036_v35  ;;  %v1043_v58 = vmul.f32 %v1683_v41, %v878_v60  ;;  %v233_v63 = vmul.f32 %v1584_v28, %v217_v34  ;;  %v235_v1 = vmul.f32 %v234_v29, %v2232_v46  ;;  %v1868_v16 = vld [vmem:[#allocation6 + $0xf0] ss:$8 sps:$4 sm:$0xff]   ;;  %v1873_v60 = vld [vmem:[#allocation6 + $0x2f4] ss:$8 sps:$4 sm:$0xff]   ;;  %v1876_v27 = vld [vmem:[#allocation6 + $0x104] ss:$8 sps:$4 sm:$0xff]  }
  0x50   :  { %992 = vmatprep.subr.bf16.mxu0 %v1843_v59  ;;  %v1684_v59 = vadd.f32 0.16666667, %v2143_v42  ;;  %v1703_v2 = vadd.f32 -0.75, %v2136_v38  ;;  %v2245_v43 = vadd.f32 %v393_v51, %v391_v50  ;;  %v1624_v5 = vadd.f32 1.1666666, %v2143_v42 }
  0x51   :  { %341 = vmatpush1.bf16.msra.mxu1 %v1838_v56  ;;  %v1041_v56 = vadd.f32 %v1040_v53, %v1038_v36  ;;  %v560_v7 = vsub.f32 0.16666667, %v2143_v42  ;;  %v236_v17 = vadd.f32 %v235_v1, %v233_v63  ;;  %v885_v19 = vmul.f32 %v1664_v54, %v2185_v18  ;;  %v1871_v18 = vld [vmem:[#allocation6 + $0x2f0] ss:$8 sps:$4 sm:$0xff]   ;;  %v1874_v29 = vld [vmem:[#allocation6 + $0x100] ss:$8 sps:$4 sm:$0xff]  }
  0x52   :  { %342 = vmatprep.subr.bf16.mxu1 %v1846_v57  ;;  %v883_v57 = vadd.f32 %v882_v47, %v880_v40  ;;  %vm1196_vm10 = vcmp.ge.f32.partialorder %v2127_v30, 1.8  ;;  %v1202_v23 = vsub.f32 4.5, %v2131_v33  ;;  %v1722_v26 = vadd.f32 -3.5, %v2131_v33  ;;  %v1877_v51 = vld [vmem:[#allocation6 + $0x300] ss:$8 sps:$4 sm:$0xff]  }
  0x53   :  { %993 = vmatpush1.bf16.msra.mxu0 %v1841_v4  ;;  %v1045_v3 = vmul.f32 %v1044_v37, %v1041_v56  ;;  %v1049_v4 = vsub.f32 1.1666666, %v2143_v42  ;;  %v2250_v8 = vmul.f32 %v1703_v2, %v1041_v56  ;;  %v1701_v25 = vsel %vm1196_vm10, 1.0, %v2077_v39  ;;  %v1886_v63 = vld [vmem:[#allocation6 + $0x120] ss:$8 sps:$4 sm:$0xff]  }
  0x54   :  { %994 = vmatprep.subr.bf16.mxu0 %v1849_v11  ;;  %v1048_v13 = vmul.f32 %v1684_v59, %v883_v57  ;;  %v887_v20 = vmul.f32 %v886_v9, %v883_v57  ;;  %v255_v34 = vpack.c.bf16 %v236_v17, %v236_v17  ;;  %v1207_v36 = vsub.f32 2.25, %v2136_v38  ;;  %v1891_v2 = vld [vmem:[#allocation6 + $0x324] ss:$8 sps:$4 sm:$0xff]  }
  0x55   :  { %343 = vmatpush1.bf16.msra.mxu1 %v1844_v10  ;;  %v1870_v10 = vld [vmem:[#allocation6 + $0xf4] ss:$8 sps:$4 sm:$0xff]   ;;  %v1046_v11 = vadd.f32 %v1045_v3, %v1043_v58  ;;  %v1723_v40 = vadd.f32 -1.25, %v2136_v38  ;;  %vm1359_vm11 = vcmp.ge.f32.partialorder %v2127_v30, 2.2  ;;  %v1365_v47 = vsub.f32 5.5, %v2131_v33 }
  0x56   :  { %344 = vmatprep.subr.bf16.mxu1 %v1852_v15  ;;  %v1865_v15 = vld [vmem:[#allocation6 + $0x2e0] ss:$8 sps:$4 sm:$0xff]   ;;  %v888_v35 = vadd.f32 %v887_v20, %v885_v19  ;;  %v1721_v50 = vsel %vm1359_vm11, 1.0, %v2077_v39  ;;  %v1212_v9 = vsub.f32 1.5, %v2143_v42  ;;  %v1724_v30 = vadd.f32 -0.5, %v2143_v42 }
  0x57   :  { %995 = vmatpush1.bf16.msra.mxu0 %v1847_v14  ;;  %v559_v14 = vmul.f32 %v1624_v5, %v2245_v43  ;;  %v1362_v37 = vsub.f32 %v1701_v25, %v1721_v50  ;;  %v1885_v33 = vld [vmem:[#allocation6 + $0x314] ss:$8 sps:$4 sm:$0xff]   ;;  %v1888_v39 = vld [vmem:[#allocation6 + $0x124] ss:$8 sps:$4 sm:$0xff]   ;;  %v1901_v20 = vld [vmem:[#allocation6 + $0x340] ss:$8 sps:$4 sm:$0xff]  }
  0x58   :  { %996 = vmatprep.subr.bf16.mxu0 %v1855_v22  ;;  %v1050_v22 = vmul.f32 %v1049_v4, %v1046_v11  ;;  %v907_v53 = vpack.c.bf16 %v888_v35, %v888_v35  ;;  %v1894_v4 = vld [vmem:[#allocation6 + $0x134] ss:$8 sps:$4 sm:$0xff]   ;;  %v1903_v17 = vld [vmem:[#allocation6 + $0x344] ss:$8 sps:$4 sm:$0xff]   ;;  %v1916_v35 = vld [vmem:[#allocation6 + $0x170] ss:$8 sps:$4 sm:$0xff]  }
  0x59   :  { %345 = vmatpush1.bf16.msra.mxu1 %v1850_v21  ;;  %v561_v21 = vmul.f32 %v560_v7, %v2179_v12  ;;  %v1199_v12 = vsub.f32 %v2227_v31, %v1701_v25  ;;  %v1882_v31 = vld [vmem:[#allocation6 + $0x114] ss:$8 sps:$4 sm:$0xff]   ;;  %v1366_v58 = vmul.f32 %v1365_v47, %v1362_v37  ;;  %v1912_v25 = vld [vmem:[#allocation6 + $0x164] ss:$8 sps:$4 sm:$0xff]  }
  0x5a   :  { %346 = vmatprep.subr.bf16.mxu1 %v1858_v32  ;;  %v2261_v28 = vadd.f32 %v1050_v22, %v1048_v13  ;;  %v1879_v32 = vld [vmem:[#allocation6 + $0x304] ss:$8 sps:$4 sm:$0xff]   ;;  %v1906_v19 = vld [vmem:[#allocation6 + $0x154] ss:$8 sps:$4 sm:$0xff]   ;;  %v1904_v22 = vld [vmem:[#allocation6 + $0x150] ss:$8 sps:$4 sm:$0xff]  }
  0x5b   :  { %997 = vmatpush1.bf16.msra.mxu0 %v1853_v44  ;;  %v2257_v24 = vadd.f32 %v561_v21, %v559_v14  ;;  %v1203_v41 = vmul.f32 %v1202_v23, %v1199_v12  ;;  %v1704_v44 = vadd.f32 -0.16666667, %v2143_v42  ;;  %v1900_v13 = vld [vmem:[#allocation6 + $0x144] ss:$8 sps:$4 sm:$0xff]   ;;  %v1895_v14 = vld [vmem:[#allocation6 + $0x330] ss:$8 sps:$4 sm:$0xff]  }
  0x5c   :  { %998 = vmatprep.subr.bf16.mxu0 %v1861_v49  ;;  %v1604_v21 = vadd.f32 1.5, %v2143_v42  ;;  %v397_v23 = vsub.f32 -0.16666667, %v2143_v42  ;;  %v1070_v47 = vpack.c.bf16 %v2261_v28, %v2261_v28  ;;  %v1936_v50 = vld [vmem:[#allocation6 + $0x1a4] ss:$8 sps:$4 sm:$0xff]  }
  0x5d   :  { %347 = vmatpush1.bf16.msra.mxu1 %v1856_v45  ;;  %v1364_v45 = vmul.f32 %v1722_v26, %v1199_v12  ;;  %v1204_v48 = vadd.f32 %v1203_v41, %v2239_v55  ;;  %v1211_v49 = vmul.f32 %v1704_v44, %v1046_v11  ;;  %v1370_v55 = vsub.f32 2.75, %v2136_v38  ;;  %v1907_v26 = vld [vmem:[#allocation6 + $0x350] ss:$8 sps:$4 sm:$0xff]   ;;  %v1924_v41 = vld [vmem:[#allocation6 + $0x184] ss:$8 sps:$4 sm:$0xff]  }
  0x5e   :  { %348 = vmatprep.subr.bf16.mxu1 %v1864_v52  ;;  %v1880_v52 = vld [vmem:[#allocation6 + $0x110] ss:$8 sps:$4 sm:$0xff]   ;;  %v1375_v38 = vsub.f32 1.8333334, %v2143_v42  ;;  %v398_v12 = vmul.f32 %v397_v23, %v2245_v43  ;;  %v1927_v43 = vld [vmem:[#allocation6 + $0x384] ss:$8 sps:$4 sm:$0xff]  }
  0x5f   :  { %999 = vmatpush1.bf16.msra.mxu0 %v1859_v61  ;;  %v1208_v54 = vmul.f32 %v1207_v36, %v1204_v48  ;;  %v1369_v56 = vmul.f32 %v1723_v40, %v1204_v48  ;;  %v1883_v61 = vld [vmem:[#allocation6 + $0x310] ss:$8 sps:$4 sm:$0xff]   ;;  %v1921_v36 = vld [vmem:[#allocation6 + $0x374] ss:$8 sps:$4 sm:$0xff]   ;;  %v1939_v28 = vld [vmem:[#allocation6 + $0x3a4] ss:$8 sps:$4 sm:$0xff]  }
  0x60   :  { %1000 = vmatprep.subr.bf16.mxu0 %v1867_v6  ;;  %v1889_v6 = vld [vmem:[#allocation6 + $0x320] ss:$8 sps:$4 sm:$0xff]   ;;  %v1919_v44 = vld [vmem:[#allocation6 + $0x370] ss:$8 sps:$4 sm:$0xff]   ;;  %v1930_v40 = vld [vmem:[#allocation6 + $0x194] ss:$8 sps:$4 sm:$0xff]  }
  0x61   :  { %349 = vmatpush1.bf16.msra.mxu1 %v1862_v62  ;;  %v1209_v59 = vadd.f32 %v1208_v54, %v2250_v8  ;;  %v1367_v62 = vadd.f32 %v1366_v58, %v1364_v45  ;;  %v1892_v8 = vld [vmem:[#allocation6 + $0x130] ss:$8 sps:$4 sm:$0xff]   ;;  %v1942_v37 = vld [vmem:[#allocation6 + $0x1b4] ss:$8 sps:$4 sm:$0xff]   ;;  %v1951_v58 = vld [vmem:[#allocation6 + $0x3c4] ss:$8 sps:$4 sm:$0xff]  }
  0x62   :  { %350 = vmatprep.subr.bf16.mxu1 %v1870_v10  ;;  %v1897_v10 = vld [vmem:[#allocation6 + $0x334] ss:$8 sps:$4 sm:$0xff]   ;;  %v1928_v48 = vld [vmem:[#allocation6 + $0x190] ss:$8 sps:$4 sm:$0xff]   ;;  %v1990_v23 = vld [vmem:[#allocation6 + $0x464] ss:$8 sps:$4 sm:$0xff]  }
  0x63   :  { %1001 = vmatpush1.bf16.msra.mxu0 %v1865_v15  ;;  %v1213_v1 = vmul.f32 %v1212_v9, %v1209_v59  ;;  %v1374_v57 = vmul.f32 %v1724_v30, %v1209_v59  ;;  %v1371_v3 = vmul.f32 %v1370_v55, %v1367_v62  ;;  %v1940_v54 = vld [vmem:[#allocation6 + $0x1b0] ss:$8 sps:$4 sm:$0xff]   ;;  %v1945_v9 = vld [vmem:[#allocation6 + $0x3b4] ss:$8 sps:$4 sm:$0xff]   ;;  %v1960_v62 = vld [vmem:[#allocation6 + $0x1e4] ss:$8 sps:$4 sm:$0xff]  }
  0x64   :  { %1002 = vmatprep.subr.bf16.mxu0 %v1873_v60  ;;  %v1909_v60 = vld [vmem:[#allocation6 + $0x354] ss:$8 sps:$4 sm:$0xff]   ;;  %v1943_v30 = vld [vmem:[#allocation6 + $0x3b0] ss:$8 sps:$4 sm:$0xff]  }
  0x65   :  { %351 = vmatpush1.bf16.msra.mxu1 %v1868_v16  ;;  %v2278_v5 = vadd.f32 %v1213_v1, %v1211_v49  ;;  %v1372_v7 = vadd.f32 %v1371_v3, %v1369_v56  ;;  %v1898_v16 = vld [vmem:[#allocation6 + $0x140] ss:$8 sps:$4 sm:$0xff]   ;;  %v1933_v49 = vld [vmem:[#allocation6 + $0x394] ss:$8 sps:$4 sm:$0xff]   ;;  %v1948_v56 = vld [vmem:[#allocation6 + $0x1c4] ss:$8 sps:$4 sm:$0xff]  }
  0x66   :  { %499 = vmatprep.subr.bf16.mxu1 %v1876_v27  ;;  %v396_v27 = vmul.f32 %v1604_v21, %v2232_v46  ;;  %v1922_v46 = vld [vmem:[#allocation6 + $0x180] ss:$8 sps:$4 sm:$0xff]   ;;  %v1954_v55 = vld [vmem:[#allocation6 + $0x1d4] ss:$8 sps:$4 sm:$0xff]   ;;  %v1952_v59 = vld [vmem:[#allocation6 + $0x1d0] ss:$8 sps:$4 sm:$0xff]  }
  0x67   :  { %1003 = vmatpush1.bf16.msra.mxu0 %v1871_v18  ;;  %v1376_v11 = vmul.f32 %v1375_v38, %v1372_v7  ;;  %v1910_v18 = vld [vmem:[#allocation6 + $0x160] ss:$8 sps:$4 sm:$0xff]   ;;  %v1964_v38 = vld [vmem:[#allocation6 + $0x1f0] ss:$8 sps:$4 sm:$0xff]   ;;  %v581_v7 = vpack.c.bf16 %v2257_v24, %v2257_v24  ;;  %v1987_v21 = vld [vmem:[#allocation6 + $0x454] ss:$8 sps:$4 sm:$0xff]  }
  0x68   :  { %369 = vmatmul.mubr.bf16.vlgmr.msra.gmra.mrb[0].mxu1 %v255_v34  ;;  %1151 = vmatprep.subr.bf16.mxu0 %v1879_v32  ;;  %v1918_v32 = vld [vmem:[#allocation6 + $0x174] ss:$8 sps:$4 sm:$0xff]   ;;  %v1913_v34 = vld [vmem:[#allocation6 + $0x360] ss:$8 sps:$4 sm:$0xff]   ;;  %v399_v42 = vadd.f32 %v398_v12, %v396_v27 }
  0x69   :  { %500 = vmatpush1.bf16.msra.mxu1 %v1874_v29  ;;  %531 = vmatprep.mubr.bf16.mxu1 %v2076_v0  ;;  %v2280_v15 = vadd.f32 %v1376_v11, %v1374_v57  ;;  %v1915_v29 = vld [vmem:[#allocation6 + $0x364] ss:$8 sps:$4 sm:$0xff]   ;;  %v1958_v1 = vld [vmem:[#allocation6 + $0x1e0] ss:$8 sps:$4 sm:$0xff]  }
  0x6a   :  { %501 = vmatprep.subr.bf16.mxu1 %v1882_v31  ;;  %1021 = vmatmul.mubr.bf16.vlgmr.msra.gmra.mrb[0].mxu0 %v907_v53  ;;  %v418_v45 = vpack.c.bf16 %v399_v42, %v399_v42  ;;  %v1925_v31 = vld [vmem:[#allocation6 + $0x380] ss:$8 sps:$4 sm:$0xff]   ;;  %v1963_v57 = vld [vmem:[#allocation6 + $0x3e4] ss:$8 sps:$4 sm:$0xff]  }
  0x6b   :  { %1152 = vmatpush1.bf16.msra.mxu0 %v1877_v51  ;;  %1183 = vmatprep.mubr.bf16.mxu0 %v2076_v0  ;;  %v1931_v51 = vld [vmem:[#allocation6 + $0x390] ss:$8 sps:$4 sm:$0xff]   ;;  %v1934_v53 = vld [vmem:[#allocation6 + $0x1a0] ss:$8 sps:$4 sm:$0xff]  }
  0x6c   :  { %1153 = vmatprep.subr.bf16.mxu0 %v1885_v33  ;;  %v1946_v33 = vld [vmem:[#allocation6 + $0x1c0] ss:$8 sps:$4 sm:$0xff]  }
  0x6d   :  { %502 = vmatpush1.bf16.msra.mxu1 %v1880_v52  ;;  %v1937_v52 = vld [vmem:[#allocation6 + $0x3a0] ss:$8 sps:$4 sm:$0xff]  }
  0x6e   :  { %503 = vmatprep.subr.bf16.mxu1 %v1888_v39  ;;  %v1949_v39 = vld [vmem:[#allocation6 + $0x3c0] ss:$8 sps:$4 sm:$0xff]  }
  0x6f   :  { %1154 = vmatpush1.bf16.msra.mxu0 %v1883_v61  ;;  %v1957_v61 = vld [vmem:[#allocation6 + $0x3d4] ss:$8 sps:$4 sm:$0xff]   ;;  %v1961_v3 = vld [vmem:[#allocation6 + $0x3e0] ss:$8 sps:$4 sm:$0xff]  }
  0x70   :  { %1155 = vmatprep.subr.bf16.mxu0 %v1891_v2  ;;  %v1966_v2 = vld [vmem:[#allocation6 + $0x1f4] ss:$8 sps:$4 sm:$0xff]   ;;  %v1970_v11 = vld [vmem:[#allocation6 + $0x400] ss:$8 sps:$4 sm:$0xff]  }
  0x71   :  { %504 = vmatpush1.bf16.msra.mxu1 %v1886_v63  ;;  %v1955_v63 = vld [vmem:[#allocation6 + $0x3d0] ss:$8 sps:$4 sm:$0xff]   ;;  %v1976_v24 = vld [vmem:[#allocation6 + $0x420] ss:$8 sps:$4 sm:$0xff]  }
  0x72   :  { %505 = vmatprep.subr.bf16.mxu1 %v1894_v4  ;;  %v1969_v4 = vld [vmem:[#allocation6 + $0x3f4] ss:$8 sps:$4 sm:$0xff]  }
  0x73   :  { %1156 = vmatpush1.bf16.msra.mxu0 %v1889_v6  ;;  %v1967_v6 = vld [vmem:[#allocation6 + $0x3f0] ss:$8 sps:$4 sm:$0xff]  }
  0x74   :  { %1157 = vmatprep.subr.bf16.mxu0 %v1897_v10  ;;  %v1233_v10 = vpack.c.bf16 %v2278_v5, %v2278_v5  ;;  %v1984_v5 = vld [vmem:[#allocation6 + $0x444] ss:$8 sps:$4 sm:$0xff]  }
  0x75   :  { %506 = vmatpush1.bf16.msra.mxu1 %v1892_v8  ;;  %v1972_v8 = vld [vmem:[#allocation6 + $0x404] ss:$8 sps:$4 sm:$0xff]  }
  0x76   :  { %507 = vmatprep.subr.bf16.mxu1 %v1900_v13  ;;  %v1975_v13 = vld [vmem:[#allocation6 + $0x414] ss:$8 sps:$4 sm:$0xff]  }
  0x77   :  { %1158 = vmatpush1.bf16.msra.mxu0 %v1895_v14  ;;  %v1973_v14 = vld [vmem:[#allocation6 + $0x410] ss:$8 sps:$4 sm:$0xff]  }
  0x78   :  { %1159 = vmatprep.subr.bf16.mxu0 %v1903_v17  ;;  %v1981_v17 = vld [vmem:[#allocation6 + $0x434] ss:$8 sps:$4 sm:$0xff]  }
  0x79   :  { %508 = vmatpush1.bf16.msra.mxu1 %v1898_v16  ;;  %v1978_v16 = vld [vmem:[#allocation6 + $0x424] ss:$8 sps:$4 sm:$0xff]  }
  0x7a   :  { %509 = vmatprep.subr.bf16.mxu1 %v1906_v19  ;;  %v1979_v19 = vld [vmem:[#allocation6 + $0x430] ss:$8 sps:$4 sm:$0xff]  }
  0x7b   :  { %1160 = vmatpush1.bf16.msra.mxu0 %v1901_v20  ;;  %v1982_v20 = vld [vmem:[#allocation6 + $0x440] ss:$8 sps:$4 sm:$0xff]  }
  0x7c   :  { %1161 = vmatprep.subr.bf16.mxu0 %v1909_v60  ;;  %v1993_v60 = vld [vmem:[#allocation6 + $0x474] ss:$8 sps:$4 sm:$0xff]  }
  0x7d   :  { %510 = vmatpush1.bf16.msra.mxu1 %v1904_v22  ;;  %v1985_v22 = vld [vmem:[#allocation6 + $0x450] ss:$8 sps:$4 sm:$0xff]  }
  0x7e   :  { %511 = vmatprep.subr.bf16.mxu1 %v1912_v25  ;;  %v1991_v25 = vld [vmem:[#allocation6 + $0x470] ss:$8 sps:$4 sm:$0xff]  }
  0x7f   :  { %1162 = vmatpush1.bf16.msra.mxu0 %v1907_v26  ;;  %v1396_v26 = vpack.c.bf16 %v2280_v15, %v2280_v15 }
  0x80   :  { %1163 = vmatprep.subr.bf16.mxu0 %v1915_v29 }
  0x81   :  { %512 = vmatpush1.bf16.msra.mxu1 %v1910_v18 }
  0x82   :  { %513 = vmatprep.subr.bf16.mxu1 %v1918_v32 }
  0x83   :  { %1164 = vmatpush1.bf16.msra.mxu0 %v1913_v34 }
  0x84   :  { %1165 = vmatprep.subr.bf16.mxu0 %v1921_v36 }
  0x85   :  { %514 = vmatpush1.bf16.msra.mxu1 %v1916_v35 }
  0x86   :  { %662 = vmatprep.subr.bf16.mxu1 %v1924_v41 }
  0x87   :  { %1166 = vmatpush1.bf16.msra.mxu0 %v1919_v44 }
  0x88   :  { %532 = vmatmul.mubr.bf16.vlgmr.msra.gmra.mrb[0].mxu1 %v418_v45  ;;  %1314 = vmatprep.subr.bf16.mxu0 %v1927_v43 }
  0x89   :  { %663 = vmatpush1.bf16.msra.mxu1 %v1922_v46  ;;  %694 = vmatprep.mubr.bf16.mxu1 %v2076_v0 }
  0x8a   :  { %664 = vmatprep.subr.bf16.mxu1 %v1930_v40  ;;  %1184 = vmatmul.mubr.bf16.vlgmr.msra.gmra.mrb[0].mxu0 %v1070_v47 }
  0x8b   :  { %1315 = vmatpush1.bf16.msra.mxu0 %v1925_v31  ;;  %1346 = vmatprep.mubr.bf16.mxu0 %v2076_v0 }
  0x8c   :  { %1316 = vmatprep.subr.bf16.mxu0 %v1933_v49 }
  0x8d   :  { %665 = vmatpush1.bf16.msra.mxu1 %v1928_v48 }
  0x8e   :  { %666 = vmatprep.subr.bf16.mxu1 %v1936_v50 }
  0x8f   :  { %1317 = vmatpush1.bf16.msra.mxu0 %v1931_v51 }
  0x90   :  { %1318 = vmatprep.subr.bf16.mxu0 %v1939_v28 }
  0x91   :  { %667 = vmatpush1.bf16.msra.mxu1 %v1934_v53 }
  0x92   :  { %668 = vmatprep.subr.bf16.mxu1 %v1942_v37 }
  0x93   :  { %1319 = vmatpush1.bf16.msra.mxu0 %v1937_v52 }
  0x94   :  { %1320 = vmatprep.subr.bf16.mxu0 %v1945_v9 }
  0x95   :  { %669 = vmatpush1.bf16.msra.mxu1 %v1940_v54 }
  0x96   :  { %670 = vmatprep.subr.bf16.mxu1 %v1948_v56 }
  0x97   :  { %1321 = vmatpush1.bf16.msra.mxu0 %v1943_v30 }
  0x98   :  { %1322 = vmatprep.subr.bf16.mxu0 %v1951_v58 }
  0x99   :  { %671 = vmatpush1.bf16.msra.mxu1 %v1946_v33 }
  0x9a   :  { %672 = vmatprep.subr.bf16.mxu1 %v1954_v55 }
  0x9b   :  { %1323 = vmatpush1.bf16.msra.mxu0 %v1949_v39 }
  0x9c   :  { %1324 = vmatprep.subr.bf16.mxu0 %v1957_v61 }
  0x9d   :  { %673 = vmatpush1.bf16.msra.mxu1 %v1952_v59 }
  0x9e   :  { %674 = vmatprep.subr.bf16.mxu1 %v1960_v62 }
  0x9f   :  { %1325 = vmatpush1.bf16.msra.mxu0 %v1955_v63 }
  0xa0   :  { %1326 = vmatprep.subr.bf16.mxu0 %v1963_v57 }
  0xa1   :  { %675 = vmatpush1.bf16.msra.mxu1 %v1958_v1 }
  0xa2   :  { %676 = vmatprep.subr.bf16.mxu1 %v1966_v2 }
  0xa3   :  { %1327 = vmatpush1.bf16.msra.mxu0 %v1961_v3 }
  0xa4   :  { %1328 = vmatprep.subr.bf16.mxu0 %v1969_v4 }
  0xa5   :  { %677 = vmatpush1.bf16.msra.mxu1 %v1964_v38 }
  0xa7   :  { %1329 = vmatpush1.bf16.msra.mxu0 %v1967_v6 }
  0xa8   :  { %695 = vmatmul.mubr.bf16.vlgmr.msra.gmra.mrb[0].mxu1 %v581_v7  ;;  %1477 = vmatprep.subr.bf16.mxu0 %v1972_v8 }
  0xaa   :  { %1347 = vmatmul.mubr.bf16.vlgmr.msra.gmra.mrb[0].mxu0 %v1233_v10 }
  0xab   :  { %1478 = vmatpush1.bf16.msra.mxu0 %v1970_v11  ;;  %1509 = vmatprep.mubr.bf16.mxu0 %v2076_v0  ;;  %v1988_v0 = vld [vmem:[#allocation6 + $0x460] ss:$8 sps:$4 sm:$0xff]  }
  0xac   :  { %1479 = vmatprep.subr.bf16.mxu0 %v1975_v13 }
  0xaf   :  { %1480 = vmatpush1.bf16.msra.mxu0 %v1973_v14 }
  0xb0   :  { %1481 = vmatprep.subr.bf16.mxu0 %v1978_v16 }
  0xb3   :  { %1482 = vmatpush1.bf16.msra.mxu0 %v1976_v24 }
  0xb4   :  { %1483 = vmatprep.subr.bf16.mxu0 %v1981_v17 }
  0xb7   :  { %1484 = vmatpush1.bf16.msra.mxu0 %v1979_v19 }
  0xb8   :  { %1485 = vmatprep.subr.bf16.mxu0 %v1984_v5 }
  0xbb   :  { %1486 = vmatpush1.bf16.msra.mxu0 %v1982_v20 }
  0xbc   :  { %1487 = vmatprep.subr.bf16.mxu0 %v1987_v21 }
  0xbf   :  { %1488 = vmatpush1.bf16.msra.mxu0 %v1985_v22 }
  0xc0   :  { %1489 = vmatprep.subr.bf16.mxu0 %v1990_v23 }
  0xc3   :  { %1490 = vmatpush1.bf16.msra.mxu0 %v1988_v0 }
  0xc4   :  { %1491 = vmatprep.subr.bf16.mxu0 %v1993_v60 }
  0xc7   :  { %1492 = vmatpush1.bf16.msra.mxu0 %v1991_v25 }
  0xca   :  { %1510 = vmatmul.mubr.bf16.vlgmr.msra.gmra.mrb[0].mxu0 %v1396_v26 }
 0x17b   :  { %v696_v18 = vpop.f32.mrb[0].mxu1 }
 0x17c   :  { %v698_v27 = vpop.f32.mrb[1].mxu1 }
 0x17d   :  { %v700_v12 = vpop.f32.mrb[2].mxu1 }
 0x17e   :  { %v701_v29 = vpop.f32.mrb[3].mxu1 }
 0x19d   :  { %v1511_v32 = vpop.f32.mrb[0].mxu0 }
 0x19e   :  { %v1741_v34 = vadd.f32 %v1511_v32, %v696_v18  ;;  %v1513_v42 = vpop.f32.mrb[1].mxu0 }
 0x19f   :  { %v1742_v35 = vadd.f32 %v1513_v42, %v698_v27  ;;  %v1515_v36 = vpop.f32.mrb[2].mxu0 }
 0x1a0   :  { %1539 = vst [vmem:[#allocation8] sm:$0xff] %v1741_v34  ;;  %1540 = vst [vmem:[#allocation8 + $0x8] sm:$0xff] %v1741_v34  ;;  %v1516_v41 = vpop.f32.mrb[3].mxu0 }
 0x1a1   :  { %v1525_v44 = vand.u32 2147483647, %v1742_v35  ;;  %v1524_v51 = vmax.f32 %v1742_v35, 0.0 }
 0x1a3   :  { %v1526_v45 = vsub.f32 0.0, %v1525_v44 }
 0x1a5   :  { %v1527_v46 = vmul.f32 1.442695, %v1526_v45 }
 0x1a7   :  { %1996 = vpow2.f32 %v1527_v46 }
 0x1b1   :  { %v1997_v43 = vpop.eup %1996 }
 0x1b2   :  { %v1529_v15 = vadd.f32 1.0, %v1997_v43  ;;  %v1532_v40 = vmul.f32 -0.5, %v1997_v43  ;;  %v1535_v31 = vand.u32 2147483647, %v1997_v43 }
 0x1b4   :  { %1998 = vlog2.f32 %v1529_v15  ;;  %v1533_v47 = vadd.f32 1.0, %v1532_v40  ;;  %vm1536_vm12 = vcmp.lt.f32.partialorder %v1535_v31, 0.0004427343 }
 0x1b6   :  { %v1534_v50 = vmul.f32 %v1997_v43, %v1533_v47 }
 0x1be   :  { %v1999_v48 = vpop.eup %1998 }
 0x1bf   :  { %v1531_v49 = vmul.f32 0.6931472, %v1999_v48 }
 0x1c1   :  { %v1537_v53 = vsel %vm1536_vm12, %v1534_v50, %v1531_v49 }
 0x1c2   :  { %v1538_v28 = vadd.f32 %v1537_v53, %v1524_v51 }
 0x1c4   :  { %1541 = vst [vmem:[#allocation8 + $0x10] sm:$0xff] %v1538_v28 }
 0x1c5   :  { %2055 = shalt.err (!%p2052_p6)
}
 0x1c6   :  { %s2056_s10 = scalar_lea.hbm %s2311_s2, 384 }
 0x1c7   :  { %p2057_p7 = scmp.ne.s32.totalorder %s2311_s2, %s2056_s10  ;;  %p2060_p8 = scmp.lt.u32.totalorder %s2056_s10, %s2311_s2 }
 0x1c9   :  { %p2062_p9 = pnand %p2060_p8, %p2057_p7 }
 0x1cb   :  { %2065 = shalt.err (!%p2062_p9)
}
 0x1cc   :  { %1551 = dma.vmem_to_hbm [thread:$0]  %s1549_s6, 384, %s2311_s2, [#allocation5]  }
 0x1cd   :  { %2070 = dma.done.wait [#allocation5], 384  }
 0x1ce   :  { %2071 = vsyncadd [#allocation5], 4294966912 }
 0x1cf   :  { %1555 = vsyncpa [#allocation4], 1 }
 0x1d0   :  { %1556 = vsyncpa [#allocation7], 1 }
 0x1d1   :  { %1557 = vsyncpa [#allocation5], 1 }

</bundles_post_ra>
